<compile_context>
chip_gen: v7x
topology: tpu7x:2x2x1
jax: 0.10.0
libtpu: 0.0.40
codegen_flags: <defaults>
</compile_context>

<pallas_src>
import functools

import jax
import jax.numpy as jnp
from jax.experimental import pallas as pl
from jax.experimental.pallas import tpu as pltpu


def _halo_pad(W):
    # Flat (H*W)-lane halo on each side of the padded scratch row. >= W+1 so all
    # 9 tap slices stay in bounds; >= 128 keeps the data-region store lane-aligned.
    return max(W + 1, 128)


# ----------------------------------------------------------------------------
# Fused kernel: one batch element per grid step, everything resident in VMEM.
# ----------------------------------------------------------------------------
def _fused_modulation_kernel(fh_ref, fr_ref, x_ref,
                             w1_ref, b1_ref, w2_ref, b2_ref,
                             w3_ref, b3_ref, w4_ref, b4_ref,
                             o_ref, pad_ref, *, C, E, H, W):
    HW = H * W
    PAD = _halo_pad(W)

    # Zero the halo buffer once; the halo columns stay zero for the whole step
    # (later convs only overwrite the data region [PAD : PAD+HW)).
    pad_ref[...] = jnp.zeros_like(pad_ref)

    # Row-boundary masks for the dx = -1 / +1 taps: flattened-lane shifts wrap
    # across image rows, and those positions must contribute zero.
    xi = jax.lax.broadcasted_iota(jnp.int32, (1, HW), 1) % W
    ok_left = xi >= 1          # source column x-1 is in range
    ok_right = xi <= W - 2     # source column x+1 is in range

    def conv3x3(v, w_ref, b_ref):
        """3x3 / stride 1 / pad 1 conv of v:(Cin, H*W) f32 -> (Cout, H*W) f32."""
        cin = v.shape[0]
        pad_ref[0:cin, PAD:PAD + HW] = v          # write into zero-halo buffer
        cols = []
        for dy in (-1, 0, 1):
            for dx in (-1, 0, 1):
                start = PAD + dy * W + dx         # static lane-shifted slice
                tap = pad_ref[0:cin, start:start + HW]
                if dx == -1:
                    tap = jnp.where(ok_left, tap, 0.0)
                elif dx == 1:
                    tap = jnp.where(ok_right, tap, 0.0)
                cols.append(tap)
        # im2col: (9*Cin, H*W), bf16 operands for the MXU, f32 accumulation.
        cols = jnp.concatenate(cols, axis=0).astype(jnp.bfloat16)
        y = jnp.dot(w_ref[...], cols, preferred_element_type=jnp.float32)
        return y + b_ref[...]                     # (Cout, H*W) + (Cout, 1)

    # combined = cat([f_hat, f_raw], channel); channels on sublanes, H*W on lanes.
    comb = jnp.concatenate([fh_ref[0], fr_ref[0]], axis=0).astype(jnp.float32)
    x = x_ref[0].astype(jnp.float32)              # (C, H*W)

    mid = conv3x3(comb, w1_ref, b1_ref)           # [scale_mid ; shift_mid] (2C, HW)
    ss = conv3x3(mid, w2_ref, b2_ref)             # [scale ; shift]         (2C, HW)
    scale = ss[0:C]
    shift = ss[C:2 * C]

    x1 = x + x * scale + shift                    # modulation (f32, VPU)
    r = conv3x3(conv3x3(x1, w3_ref, b3_ref), w4_ref, b4_ref)
    o_ref[0] = (x1 + r).astype(o_ref.dtype)       # residual refine, lane-dense store


# ----------------------------------------------------------------------------
# Weight packing (done once in the wrapper, outside the kernel)
# ----------------------------------------------------------------------------
def _pack_conv_weight(w_oihw):
    """PyTorch (Cout, Cin, 3, 3) -> (Cout, 9*Cin) matching the kernel's im2col
    column order: column = (ky*3 + kx) * Cin + cin."""
    cout, cin, kh, kw = w_oihw.shape
    w = jnp.transpose(w_oihw, (2, 3, 1, 0)).reshape(kh * kw * cin, cout)
    return jnp.transpose(w, (1, 0))


def _block_diag_oihw(wa, wb):
    """Fuse two convs with independent inputs/outputs into one block-diagonal
    conv over concatenated channels (per-tap block-diagonal on (cout, cin))."""
    za = jnp.zeros((wa.shape[0], wb.shape[1]) + wa.shape[2:], wa.dtype)
    zb = jnp.zeros((wb.shape[0], wa.shape[1]) + wb.shape[2:], wb.dtype)
    top = jnp.concatenate([wa, za], axis=1)
    bot = jnp.concatenate([zb, wb], axis=1)
    return jnp.concatenate([top, bot], axis=0)


# ----------------------------------------------------------------------------
# Public forward (inputs/outputs keep the PyTorch NCHW convention)
# ----------------------------------------------------------------------------
def modulation_forward(params, x, f_hat, f_raw):
    """x: (B, C, H, W); f_hat, f_raw: (B, E, H, W). Returns (B, C, H, W)."""
    B, C, H, W = x.shape
    E = f_hat.shape[1]
    HW = H * W
    PAD = _halo_pad(W)
    Cmax = max(2 * E, 2 * C)

    (ws1, bs1) = params["scale1"]
    (ws2, bs2) = params["scale2"]
    (wt1, bt1) = params["shift1"]
    (wt2, bt2) = params["shift2"]
    (wr1, br1) = params["refine1"]
    (wr2, br2) = params["refine2"]

    # Fused scale||shift first conv (Cout=2C, Cin=2E) and block-diagonal second
    # conv (Cout=2C, Cin=2C). Matmul operands in bf16; biases stay f32.
    w1 = _pack_conv_weight(jnp.concatenate([ws1, wt1], axis=0)).astype(jnp.bfloat16)
    b1 = jnp.concatenate([bs1, bt1]).astype(jnp.float32).reshape(2 * C, 1)
    w2 = _pack_conv_weight(_block_diag_oihw(ws2, wt2)).astype(jnp.bfloat16)
    b2 = jnp.concatenate([bs2, bt2]).astype(jnp.float32).reshape(2 * C, 1)
    w3 = _pack_conv_weight(wr1).astype(jnp.bfloat16)
    b3 = br1.astype(jnp.float32).reshape(C, 1)
    w4 = _pack_conv_weight(wr2).astype(jnp.bfloat16)
    b4 = br2.astype(jnp.float32).reshape(C, 1)

    kernel = functools.partial(_fused_modulation_kernel, C=C, E=E, H=H, W=W)
    const = lambda b: (0, 0)

    out = pl.pallas_call(
        kernel,
        out_shape=jax.ShapeDtypeStruct((B, C, HW), x.dtype),
        grid=(B,),
        in_specs=[
            pl.BlockSpec((1, E, HW), lambda b: (b, 0, 0)),     # f_hat
            pl.BlockSpec((1, E, HW), lambda b: (b, 0, 0)),     # f_raw
            pl.BlockSpec((1, C, HW), lambda b: (b, 0, 0)),     # x
            pl.BlockSpec((2 * C, 9 * 2 * E), const),           # w1 (scale1||shift1)
            pl.BlockSpec((2 * C, 1), const),                   # b1
            pl.BlockSpec((2 * C, 9 * 2 * C), const),           # w2 (block-diag)
            pl.BlockSpec((2 * C, 1), const),                   # b2
            pl.BlockSpec((C, 9 * C), const),                   # w3 (refine1)
            pl.BlockSpec((C, 1), const),                       # b3
            pl.BlockSpec((C, 9 * C), const),                   # w4 (refine2)
            pl.BlockSpec((C, 1), const),                       # b4
        ],
        out_specs=pl.BlockSpec((1, C, HW), lambda b: (b, 0, 0)),
        scratch_shapes=[pltpu.VMEM((Cmax, HW + 2 * PAD), jnp.float32)],
        compiler_params=pltpu.CompilerParams(
            dimension_semantics=("parallel",)),  # v7x: batch split across both TCs
    )(f_hat.reshape(B, E, HW), f_raw.reshape(B, E, HW), x.reshape(B, C, HW),
      w1, b1, w2, b2, w3, b3, w4, b4)

    return out.reshape(B, C, H, W)


# ----------------------------------------------------------------------------
# Parameter init (PyTorch OIHW layout) + pure-JAX reference
# ----------------------------------------------------------------------------
def init_modulation_params(key, in_channels, embed_channels, dtype=jnp.float32):
    C, E = in_channels, embed_channels
    shapes = {
        "scale1": (C, 2 * E), "scale2": (C, C),
        "shift1": (C, 2 * E), "shift2": (C, C),
        "refine1": (C, C), "refine2": (C, C),
    }
    params = {}
    for i, (name, (cout, cin)) in enumerate(shapes.items()):
        kw, kb = jax.random.split(jax.random.fold_in(key, i))
        w = 0.05 * jax.random.normal(kw, (cout, cin, 3, 3), dtype)
        b = 0.05 * jax.random.normal(kb, (cout,), dtype)
        params[name] = (w, b)
    return params


def _ref_conv3x3(x, w, b):
    # bf16 operands + f32 accumulation, mirroring the kernel's MXU precision.
    y = jax.lax.conv_general_dilated(
        x.astype(jnp.bfloat16), w.astype(jnp.bfloat16),
        window_strides=(1, 1), padding=((1, 1), (1, 1)),
        dimension_numbers=("NCHW", "OIHW", "NCHW"),
        preferred_element_type=jnp.float32)
    return y + b.reshape(1, -1, 1, 1).astype(jnp.float32)


def modulation_reference(params, x, f_hat, f_raw):
    c = jnp.concatenate([f_hat, f_raw], axis=1)
    scale = _ref_conv3x3(_ref_conv3x3(c, *params["scale1"]), *params["scale2"])
    shift = _ref_conv3x3(_ref_conv3x3(c, *params["shift1"]), *params["shift2"])
    x1 = x + x * scale + shift
    r = _ref_conv3x3(_ref_conv3x3(x1, *params["refine1"]), *params["refine2"])
    return x1 + r


# ----------------------------------------------------------------------------
if __name__ == "__main__":
    B, C_IN, C_EMB, H, W = 2, 16, 8, 16, 16

    key = jax.random.PRNGKey(0)
    k_x, k_fh, k_fr, k_p = jax.random.split(key, 4)
    x = jax.random.normal(k_x, (B, C_IN, H, W), jnp.float32)
    f_hat = jax.random.normal(k_fh, (B, C_EMB, H, W), jnp.float32)
    f_raw = jax.random.normal(k_fr, (B, C_EMB, H, W), jnp.float32)
    params = init_modulation_params(k_p, C_IN, C_EMB)

    fwd = jax.jit(modulation_forward)
    out = jax.block_until_ready(fwd(params, x, f_hat, f_raw))
    assert out.shape == (B, C_IN, H, W)

    ref = jax.block_until_ready(modulation_reference(params, x, f_hat, f_raw))
    max_err = float(jnp.max(jnp.abs(out - ref)))
    # bf16 matmul operands with f32 accumulation on both sides; tolerance sized
    # to bf16 rounding over the 4-conv chain (typical observed error ~1e-3).
    assert max_err < 2e-2, f"mismatch vs reference: max_err={max_err}"

    print("KERNEL_OK")
</pallas_src>

<mosaic_0001>
module attributes {stable_mosaic.version = 11 : i64} {
  func.func @_fused_modulation_kernel(%arg0: i32, %arg1: memref<1x8x256xf32, #tpu.memory_space<vmem>>, %arg2: memref<1x8x256xf32, #tpu.memory_space<vmem>>, %arg3: memref<1x16x256xf32, #tpu.memory_space<vmem>>, %arg4: memref<32x144xbf16, #tpu.memory_space<vmem>>, %arg5: memref<32x1xf32, #tpu.memory_space<vmem>>, %arg6: memref<32x288xbf16, #tpu.memory_space<vmem>>, %arg7: memref<32x1xf32, #tpu.memory_space<vmem>>, %arg8: memref<16x144xbf16, #tpu.memory_space<vmem>>, %arg9: memref<16x1xf32, #tpu.memory_space<vmem>>, %arg10: memref<16x144xbf16, #tpu.memory_space<vmem>>, %arg11: memref<16x1xf32, #tpu.memory_space<vmem>>, %arg12: memref<1x16x256xf32, #tpu.memory_space<vmem>>, %arg13: memref<32x512xf32, #tpu.memory_space<vmem>>) attributes {dimension_semantics = [#tpu.dimension_semantics<parallel>], iteration_bounds = array<i64: 2>, scalar_prefetch = 0 : i64, scratch_operands = 1 : i64, tpu.core_type = #tpu.core_type<tc>, window_params = [{transform_indices = @transform_0, window_bounds = array<i64: 1, 8, 256>}, {transform_indices = @transform_1, window_bounds = array<i64: 1, 8, 256>}, {transform_indices = @transform_2, window_bounds = array<i64: 1, 16, 256>}, {pipeline_mode = #tpu.pipeline_mode<synchronous>, transform_indices = @transform_3, window_bounds = array<i64: 32, 144>}, {pipeline_mode = #tpu.pipeline_mode<synchronous>, transform_indices = @transform_4, window_bounds = array<i64: 32, 1>}, {pipeline_mode = #tpu.pipeline_mode<synchronous>, transform_indices = @transform_5, window_bounds = array<i64: 32, 288>}, {pipeline_mode = #tpu.pipeline_mode<synchronous>, transform_indices = @transform_6, window_bounds = array<i64: 32, 1>}, {pipeline_mode = #tpu.pipeline_mode<synchronous>, transform_indices = @transform_7, window_bounds = array<i64: 16, 144>}, {pipeline_mode = #tpu.pipeline_mode<synchronous>, transform_indices = @transform_8, window_bounds = array<i64: 16, 1>}, {pipeline_mode = #tpu.pipeline_mode<synchronous>, transform_indices = @transform_9, window_bounds = array<i64: 16, 144>}, {pipeline_mode = #tpu.pipeline_mode<synchronous>, transform_indices = @transform_10, window_bounds = array<i64: 16, 1>}, {transform_indices = @transform_11, window_bounds = array<i64: 1, 16, 256>}]} {
    %cst = arith.constant 0.000000e+00 : f32
    %0 = vector.broadcast %cst : f32 to vector<32x512xf32>
    %c0 = arith.constant 0 : index
    %c0_0 = arith.constant 0 : index
    %1 = vector.load %arg13[%c0, %c0_0] : memref<32x512xf32, #tpu.memory_space<vmem>>, vector<32x512xf32>
    tpu.vector_store %arg13[%c0, %c0_0], %0 {strides = array<i32>} : memref<32x512xf32, #tpu.memory_space<vmem>>, vector<32x512xf32>,
    %2 = tpu.iota {dimensions = array<i32: 1>} : vector<1x256xi32>
    %c16_i32 = arith.constant 16 : i32
    %c0_i32 = arith.constant 0 : i32
    %3 = arith.cmpi eq, %c16_i32, %c0_i32 : i32
    %c1_i32 = arith.constant 1 : i32
    %4 = arith.select %3, %c1_i32, %c16_i32 : i32
    %5 = vector.broadcast %4 : i32 to vector<1x256xi32>
    %6 = arith.remsi %2, %5 : vector<1x256xi32>
    %c0_i32_1 = arith.constant 0 : i32
    %7 = vector.broadcast %c0_i32_1 : i32 to vector<1x256xi32>
    %8 = arith.cmpi ne, %6, %7 : vector<1x256xi32>
    %c0_i32_2 = arith.constant 0 : i32
    %9 = vector.broadcast %c0_i32_2 : i32 to vector<1x256xi32>
    %10 = arith.cmpi slt, %6, %9 : vector<1x256xi32>
    %c0_i32_3 = arith.constant 0 : i32
    %11 = arith.cmpi slt, %4, %c0_i32_3 : i32
    %12 = vector.broadcast %11 : i1 to vector<1x256xi1>
    %13 = vector.broadcast %12 : vector<1x256xi1> to vector<1x256xi1>
    %14 = arith.xori %10, %13 : vector<1x256xi1>
    %15 = arith.andi %14, %8 : vector<1x256xi1>
    %16 = vector.broadcast %4 : i32 to vector<1x256xi32>
    %17 = arith.addi %6, %16 : vector<1x256xi32>
    %18 = arith.select %15, %17, %6 : vector<1x256xi1>, vector<1x256xi32>
    %c1_i32_4 = arith.constant 1 : i32
    %19 = vector.broadcast %c1_i32_4 : i32 to vector<1x256xi32>
    %20 = arith.cmpi sge, %18, %19 : vector<1x256xi32>
    %c14_i32 = arith.constant 14 : i32
    %21 = vector.broadcast %c14_i32 : i32 to vector<1x256xi32>
    %22 = arith.cmpi sle, %18, %21 : vector<1x256xi32>
    %c0_5 = arith.constant 0 : index
    %c0_6 = arith.constant 0 : index
    %c0_7 = arith.constant 0 : index
    %23 = vector.load %arg1[%c0_5, %c0_6, %c0_7] : memref<1x8x256xf32, #tpu.memory_space<vmem>>, vector<1x8x256xf32>
    %24 = vector.shape_cast %23 : vector<1x8x256xf32> to vector<8x256xf32>
    %c0_8 = arith.constant 0 : index
    %c0_9 = arith.constant 0 : index
    %c0_10 = arith.constant 0 : index
    %25 = vector.load %arg2[%c0_8, %c0_9, %c0_10] : memref<1x8x256xf32, #tpu.memory_space<vmem>>, vector<1x8x256xf32>
    %26 = vector.shape_cast %25 : vector<1x8x256xf32> to vector<8x256xf32>
    %27 = tpu.concatenate %24, %26 in 0 : vector<8x256xf32>, vector<8x256xf32> -> vector<16x256xf32>
    %c0_11 = arith.constant 0 : index
    %c0_12 = arith.constant 0 : index
    %c0_13 = arith.constant 0 : index
    %28 = vector.load %arg3[%c0_11, %c0_12, %c0_13] : memref<1x16x256xf32, #tpu.memory_space<vmem>>, vector<1x16x256xf32>
    %29 = vector.shape_cast %28 : vector<1x16x256xf32> to vector<16x256xf32>
    %c0_14 = arith.constant 0 : index
    %c128 = arith.constant 128 : index
    %30 = vector.load %arg13[%c0_14, %c128] : memref<32x512xf32, #tpu.memory_space<vmem>>, vector<16x256xf32>
    tpu.vector_store %arg13[%c0_14, %c128], %27 {strides = array<i32>} : memref<32x512xf32, #tpu.memory_space<vmem>>, vector<16x256xf32>,
    %c0_15 = arith.constant 0 : index
    %c111 = arith.constant 111 : index
    %31 = vector.load %arg13[%c0_15, %c111] : memref<32x512xf32, #tpu.memory_space<vmem>>, vector<16x256xf32>
    %cst_16 = arith.constant 0.000000e+00 : f32
    %32 = vector.shape_cast %20 : vector<1x256xi1> to vector<1x256xi1>
    %33 = vector.broadcast %32 : vector<1x256xi1> to vector<16x256xi1>
    %34 = vector.broadcast %cst_16 : f32 to vector<16x256xf32>
    %35 = arith.select %33, %31, %34 : vector<16x256xi1>, vector<16x256xf32>
    %c0_17 = arith.constant 0 : index
    %c112 = arith.constant 112 : index
    %36 = vector.load %arg13[%c0_17, %c112] : memref<32x512xf32, #tpu.memory_space<vmem>>, vector<16x256xf32>
    %c0_18 = arith.constant 0 : index
    %c113 = arith.constant 113 : index
    %37 = vector.load %arg13[%c0_18, %c113] : memref<32x512xf32, #tpu.memory_space<vmem>>, vector<16x256xf32>
    %cst_19 = arith.constant 0.000000e+00 : f32
    %38 = vector.shape_cast %22 : vector<1x256xi1> to vector<1x256xi1>
    %39 = vector.broadcast %38 : vector<1x256xi1> to vector<16x256xi1>
    %40 = vector.broadcast %cst_19 : f32 to vector<16x256xf32>
    %41 = arith.select %39, %37, %40 : vector<16x256xi1>, vector<16x256xf32>
    %c0_20 = arith.constant 0 : index
    %c127 = arith.constant 127 : index
    %42 = vector.load %arg13[%c0_20, %c127] : memref<32x512xf32, #tpu.memory_space<vmem>>, vector<16x256xf32>
    %cst_21 = arith.constant 0.000000e+00 : f32
    %43 = vector.shape_cast %20 : vector<1x256xi1> to vector<1x256xi1>
    %44 = vector.broadcast %43 : vector<1x256xi1> to vector<16x256xi1>
    %45 = vector.broadcast %cst_21 : f32 to vector<16x256xf32>
    %46 = arith.select %44, %42, %45 : vector<16x256xi1>, vector<16x256xf32>
    %c0_22 = arith.constant 0 : index
    %c128_23 = arith.constant 128 : index
    %47 = vector.load %arg13[%c0_22, %c128_23] : memref<32x512xf32, #tpu.memory_space<vmem>>, vector<16x256xf32>
    %c0_24 = arith.constant 0 : index
    %c129 = arith.constant 129 : index
    %48 = vector.load %arg13[%c0_24, %c129] : memref<32x512xf32, #tpu.memory_space<vmem>>, vector<16x256xf32>
    %cst_25 = arith.constant 0.000000e+00 : f32
    %49 = vector.shape_cast %22 : vector<1x256xi1> to vector<1x256xi1>
    %50 = vector.broadcast %49 : vector<1x256xi1> to vector<16x256xi1>
    %51 = vector.broadcast %cst_25 : f32 to vector<16x256xf32>
    %52 = arith.select %50, %48, %51 : vector<16x256xi1>, vector<16x256xf32>
    %c0_26 = arith.constant 0 : index
    %c143 = arith.constant 143 : index
    %53 = vector.load %arg13[%c0_26, %c143] : memref<32x512xf32, #tpu.memory_space<vmem>>, vector<16x256xf32>
    %cst_27 = arith.constant 0.000000e+00 : f32
    %54 = vector.shape_cast %20 : vector<1x256xi1> to vector<1x256xi1>
    %55 = vector.broadcast %54 : vector<1x256xi1> to vector<16x256xi1>
    %56 = vector.broadcast %cst_27 : f32 to vector<16x256xf32>
    %57 = arith.select %55, %53, %56 : vector<16x256xi1>, vector<16x256xf32>
    %c0_28 = arith.constant 0 : index
    %c144 = arith.constant 144 : index
    %58 = vector.load %arg13[%c0_28, %c144] : memref<32x512xf32, #tpu.memory_space<vmem>>, vector<16x256xf32>
    %c0_29 = arith.constant 0 : index
    %c145 = arith.constant 145 : index
    %59 = vector.load %arg13[%c0_29, %c145] : memref<32x512xf32, #tpu.memory_space<vmem>>, vector<16x256xf32>
    %cst_30 = arith.constant 0.000000e+00 : f32
    %60 = vector.shape_cast %22 : vector<1x256xi1> to vector<1x256xi1>
    %61 = vector.broadcast %60 : vector<1x256xi1> to vector<16x256xi1>
    %62 = vector.broadcast %cst_30 : f32 to vector<16x256xf32>
    %63 = arith.select %61, %59, %62 : vector<16x256xi1>, vector<16x256xf32>
    %64 = tpu.concatenate %35, %36, %41, %46, %47, %52, %57, %58, %63 in 0 : vector<16x256xf32>, vector<16x256xf32>, vector<16x256xf32>, vector<16x256xf32>, vector<16x256xf32>, vector<16x256xf32>, vector<16x256xf32>, vector<16x256xf32>, vector<16x256xf32> -> vector<144x256xf32>
    %65 = arith.truncf %64 : vector<144x256xf32> to vector<144x256xbf16>
    %c0_31 = arith.constant 0 : index
    %c0_32 = arith.constant 0 : index
    %66 = vector.load %arg4[%c0_31, %c0_32] : memref<32x144xbf16, #tpu.memory_space<vmem>>, vector<32x144xbf16>
    %cst_33 = arith.constant dense<0.000000e+00> : vector<32x256xf32>
    %67 = tpu.matmul %66, %65, %cst_33 {dimension_numbers = #tpu.dot_dimension_numbers<[1], [0], [0], [1], [0, 0, 1, 1], [], []>} : vector<32x144xbf16>, vector<144x256xbf16>, vector<32x256xf32> -> vector<32x256xf32>
    %c0_34 = arith.constant 0 : index
    %c0_35 = arith.constant 0 : index
    %68 = vector.load %arg5[%c0_34, %c0_35] : memref<32x1xf32, #tpu.memory_space<vmem>>, vector<32x1xf32>
    %69 = vector.broadcast %68 : vector<32x1xf32> to vector<32x256xf32>
    %70 = arith.addf %67, %69 : vector<32x256xf32>
    %c0_36 = arith.constant 0 : index
    %c128_37 = arith.constant 128 : index
    %71 = vector.load %arg13[%c0_36, %c128_37] : memref<32x512xf32, #tpu.memory_space<vmem>>, vector<32x256xf32>
    tpu.vector_store %arg13[%c0_36, %c128_37], %70 {strides = array<i32>} : memref<32x512xf32, #tpu.memory_space<vmem>>, vector<32x256xf32>,
    %c0_38 = arith.constant 0 : index
    %c111_39 = arith.constant 111 : index
    %72 = vector.load %arg13[%c0_38, %c111_39] : memref<32x512xf32, #tpu.memory_space<vmem>>, vector<32x256xf32>
    %cst_40 = arith.constant 0.000000e+00 : f32
    %73 = vector.shape_cast %20 : vector<1x256xi1> to vector<1x256xi1>
    %74 = vector.broadcast %73 : vector<1x256xi1> to vector<32x256xi1>
    %75 = vector.broadcast %cst_40 : f32 to vector<32x256xf32>
    %76 = arith.select %74, %72, %75 : vector<32x256xi1>, vector<32x256xf32>
    %c0_41 = arith.constant 0 : index
    %c112_42 = arith.constant 112 : index
    %77 = vector.load %arg13[%c0_41, %c112_42] : memref<32x512xf32, #tpu.memory_space<vmem>>, vector<32x256xf32>
    %c0_43 = arith.constant 0 : index
    %c113_44 = arith.constant 113 : index
    %78 = vector.load %arg13[%c0_43, %c113_44] : memref<32x512xf32, #tpu.memory_space<vmem>>, vector<32x256xf32>
    %cst_45 = arith.constant 0.000000e+00 : f32
    %79 = vector.shape_cast %22 : vector<1x256xi1> to vector<1x256xi1>
    %80 = vector.broadcast %79 : vector<1x256xi1> to vector<32x256xi1>
    %81 = vector.broadcast %cst_45 : f32 to vector<32x256xf32>
    %82 = arith.select %80, %78, %81 : vector<32x256xi1>, vector<32x256xf32>
    %c0_46 = arith.constant 0 : index
    %c127_47 = arith.constant 127 : index
    %83 = vector.load %arg13[%c0_46, %c127_47] : memref<32x512xf32, #tpu.memory_space<vmem>>, vector<32x256xf32>
    %cst_48 = arith.constant 0.000000e+00 : f32
    %84 = vector.shape_cast %20 : vector<1x256xi1> to vector<1x256xi1>
    %85 = vector.broadcast %84 : vector<1x256xi1> to vector<32x256xi1>
    %86 = vector.broadcast %cst_48 : f32 to vector<32x256xf32>
    %87 = arith.select %85, %83, %86 : vector<32x256xi1>, vector<32x256xf32>
    %c0_49 = arith.constant 0 : index
    %c128_50 = arith.constant 128 : index
    %88 = vector.load %arg13[%c0_49, %c128_50] : memref<32x512xf32, #tpu.memory_space<vmem>>, vector<32x256xf32>
    %c0_51 = arith.constant 0 : index
    %c129_52 = arith.constant 129 : index
    %89 = vector.load %arg13[%c0_51, %c129_52] : memref<32x512xf32, #tpu.memory_space<vmem>>, vector<32x256xf32>
    %cst_53 = arith.constant 0.000000e+00 : f32
    %90 = vector.shape_cast %22 : vector<1x256xi1> to vector<1x256xi1>
    %91 = vector.broadcast %90 : vector<1x256xi1> to vector<32x256xi1>
    %92 = vector.broadcast %cst_53 : f32 to vector<32x256xf32>
    %93 = arith.select %91, %89, %92 : vector<32x256xi1>, vector<32x256xf32>
    %c0_54 = arith.constant 0 : index
    %c143_55 = arith.constant 143 : index
    %94 = vector.load %arg13[%c0_54, %c143_55] : memref<32x512xf32, #tpu.memory_space<vmem>>, vector<32x256xf32>
    %cst_56 = arith.constant 0.000000e+00 : f32
    %95 = vector.shape_cast %20 : vector<1x256xi1> to vector<1x256xi1>
    %96 = vector.broadcast %95 : vector<1x256xi1> to vector<32x256xi1>
    %97 = vector.broadcast %cst_56 : f32 to vector<32x256xf32>
    %98 = arith.select %96, %94, %97 : vector<32x256xi1>, vector<32x256xf32>
    %c0_57 = arith.constant 0 : index
    %c144_58 = arith.constant 144 : index
    %99 = vector.load %arg13[%c0_57, %c144_58] : memref<32x512xf32, #tpu.memory_space<vmem>>, vector<32x256xf32>
    %c0_59 = arith.constant 0 : index
    %c145_60 = arith.constant 145 : index
    %100 = vector.load %arg13[%c0_59, %c145_60] : memref<32x512xf32, #tpu.memory_space<vmem>>, vector<32x256xf32>
    %cst_61 = arith.constant 0.000000e+00 : f32
    %101 = vector.shape_cast %22 : vector<1x256xi1> to vector<1x256xi1>
    %102 = vector.broadcast %101 : vector<1x256xi1> to vector<32x256xi1>
    %103 = vector.broadcast %cst_61 : f32 to vector<32x256xf32>
    %104 = arith.select %102, %100, %103 : vector<32x256xi1>, vector<32x256xf32>
    %105 = tpu.concatenate %76, %77, %82, %87, %88, %93, %98, %99, %104 in 0 : vector<32x256xf32>, vector<32x256xf32>, vector<32x256xf32>, vector<32x256xf32>, vector<32x256xf32>, vector<32x256xf32>, vector<32x256xf32>, vector<32x256xf32>, vector<32x256xf32> -> vector<288x256xf32>
    %106 = arith.truncf %105 : vector<288x256xf32> to vector<288x256xbf16>
    %c0_62 = arith.constant 0 : index
    %c0_63 = arith.constant 0 : index
    %107 = vector.load %arg6[%c0_62, %c0_63] : memref<32x288xbf16, #tpu.memory_space<vmem>>, vector<32x288xbf16>
    %cst_64 = arith.constant dense<0.000000e+00> : vector<32x256xf32>
    %108 = tpu.matmul %107, %106, %cst_64 {dimension_numbers = #tpu.dot_dimension_numbers<[1], [0], [0], [1], [0, 0, 1, 1], [], []>} : vector<32x288xbf16>, vector<288x256xbf16>, vector<32x256xf32> -> vector<32x256xf32>
    %c0_65 = arith.constant 0 : index
    %c0_66 = arith.constant 0 : index
    %109 = vector.load %arg7[%c0_65, %c0_66] : memref<32x1xf32, #tpu.memory_space<vmem>>, vector<32x1xf32>
    %110 = vector.broadcast %109 : vector<32x1xf32> to vector<32x256xf32>
    %111 = arith.addf %108, %110 : vector<32x256xf32>
    %112 = vector.extract_strided_slice %111 {offsets = [0, 0], sizes = [16, 256], strides = [1, 1]} : vector<32x256xf32> to vector<16x256xf32>
    %113 = vector.extract_strided_slice %111 {offsets = [16, 0], sizes = [16, 256], strides = [1, 1]} : vector<32x256xf32> to vector<16x256xf32>
    %114 = arith.mulf %29, %112 : vector<16x256xf32>
    %115 = arith.addf %29, %114 : vector<16x256xf32>
    %116 = arith.addf %115, %113 : vector<16x256xf32>
    %c0_67 = arith.constant 0 : index
    %c128_68 = arith.constant 128 : index
    %117 = vector.load %arg13[%c0_67, %c128_68] : memref<32x512xf32, #tpu.memory_space<vmem>>, vector<16x256xf32>
    tpu.vector_store %arg13[%c0_67, %c128_68], %116 {strides = array<i32>} : memref<32x512xf32, #tpu.memory_space<vmem>>, vector<16x256xf32>,
    %c0_69 = arith.constant 0 : index
    %c111_70 = arith.constant 111 : index
    %118 = vector.load %arg13[%c0_69, %c111_70] : memref<32x512xf32, #tpu.memory_space<vmem>>, vector<16x256xf32>
    %cst_71 = arith.constant 0.000000e+00 : f32
    %119 = vector.shape_cast %20 : vector<1x256xi1> to vector<1x256xi1>
    %120 = vector.broadcast %119 : vector<1x256xi1> to vector<16x256xi1>
    %121 = vector.broadcast %cst_71 : f32 to vector<16x256xf32>
    %122 = arith.select %120, %118, %121 : vector<16x256xi1>, vector<16x256xf32>
    %c0_72 = arith.constant 0 : index
    %c112_73 = arith.constant 112 : index
    %123 = vector.load %arg13[%c0_72, %c112_73] : memref<32x512xf32, #tpu.memory_space<vmem>>, vector<16x256xf32>
    %c0_74 = arith.constant 0 : index
    %c113_75 = arith.constant 113 : index
    %124 = vector.load %arg13[%c0_74, %c113_75] : memref<32x512xf32, #tpu.memory_space<vmem>>, vector<16x256xf32>
    %cst_76 = arith.constant 0.000000e+00 : f32
    %125 = vector.shape_cast %22 : vector<1x256xi1> to vector<1x256xi1>
    %126 = vector.broadcast %125 : vector<1x256xi1> to vector<16x256xi1>
    %127 = vector.broadcast %cst_76 : f32 to vector<16x256xf32>
    %128 = arith.select %126, %124, %127 : vector<16x256xi1>, vector<16x256xf32>
    %c0_77 = arith.constant 0 : index
    %c127_78 = arith.constant 127 : index
    %129 = vector.load %arg13[%c0_77, %c127_78] : memref<32x512xf32, #tpu.memory_space<vmem>>, vector<16x256xf32>
    %cst_79 = arith.constant 0.000000e+00 : f32
    %130 = vector.shape_cast %20 : vector<1x256xi1> to vector<1x256xi1>
    %131 = vector.broadcast %130 : vector<1x256xi1> to vector<16x256xi1>
    %132 = vector.broadcast %cst_79 : f32 to vector<16x256xf32>
    %133 = arith.select %131, %129, %132 : vector<16x256xi1>, vector<16x256xf32>
    %c0_80 = arith.constant 0 : index
    %c128_81 = arith.constant 128 : index
    %134 = vector.load %arg13[%c0_80, %c128_81] : memref<32x512xf32, #tpu.memory_space<vmem>>, vector<16x256xf32>
    %c0_82 = arith.constant 0 : index
    %c129_83 = arith.constant 129 : index
    %135 = vector.load %arg13[%c0_82, %c129_83] : memref<32x512xf32, #tpu.memory_space<vmem>>, vector<16x256xf32>
    %cst_84 = arith.constant 0.000000e+00 : f32
    %136 = vector.shape_cast %22 : vector<1x256xi1> to vector<1x256xi1>
    %137 = vector.broadcast %136 : vector<1x256xi1> to vector<16x256xi1>
    %138 = vector.broadcast %cst_84 : f32 to vector<16x256xf32>
    %139 = arith.select %137, %135, %138 : vector<16x256xi1>, vector<16x256xf32>
    %c0_85 = arith.constant 0 : index
    %c143_86 = arith.constant 143 : index
    %140 = vector.load %arg13[%c0_85, %c143_86] : memref<32x512xf32, #tpu.memory_space<vmem>>, vector<16x256xf32>
    %cst_87 = arith.constant 0.000000e+00 : f32
    %141 = vector.shape_cast %20 : vector<1x256xi1> to vector<1x256xi1>
    %142 = vector.broadcast %141 : vector<1x256xi1> to vector<16x256xi1>
    %143 = vector.broadcast %cst_87 : f32 to vector<16x256xf32>
    %144 = arith.select %142, %140, %143 : vector<16x256xi1>, vector<16x256xf32>
    %c0_88 = arith.constant 0 : index
    %c144_89 = arith.constant 144 : index
    %145 = vector.load %arg13[%c0_88, %c144_89] : memref<32x512xf32, #tpu.memory_space<vmem>>, vector<16x256xf32>
    %c0_90 = arith.constant 0 : index
    %c145_91 = arith.constant 145 : index
    %146 = vector.load %arg13[%c0_90, %c145_91] : memref<32x512xf32, #tpu.memory_space<vmem>>, vector<16x256xf32>
    %cst_92 = arith.constant 0.000000e+00 : f32
    %147 = vector.shape_cast %22 : vector<1x256xi1> to vector<1x256xi1>
    %148 = vector.broadcast %147 : vector<1x256xi1> to vector<16x256xi1>
    %149 = vector.broadcast %cst_92 : f32 to vector<16x256xf32>
    %150 = arith.select %148, %146, %149 : vector<16x256xi1>, vector<16x256xf32>
    %151 = tpu.concatenate %122, %123, %128, %133, %134, %139, %144, %145, %150 in 0 : vector<16x256xf32>, vector<16x256xf32>, vector<16x256xf32>, vector<16x256xf32>, vector<16x256xf32>, vector<16x256xf32>, vector<16x256xf32>, vector<16x256xf32>, vector<16x256xf32> -> vector<144x256xf32>
    %152 = arith.truncf %151 : vector<144x256xf32> to vector<144x256xbf16>
    %c0_93 = arith.constant 0 : index
    %c0_94 = arith.constant 0 : index
    %153 = vector.load %arg8[%c0_93, %c0_94] : memref<16x144xbf16, #tpu.memory_space<vmem>>, vector<16x144xbf16>
    %cst_95 = arith.constant dense<0.000000e+00> : vector<16x256xf32>
    %154 = tpu.matmul %153, %152, %cst_95 {dimension_numbers = #tpu.dot_dimension_numbers<[1], [0], [0], [1], [0, 0, 1, 1], [], []>} : vector<16x144xbf16>, vector<144x256xbf16>, vector<16x256xf32> -> vector<16x256xf32>
    %c0_96 = arith.constant 0 : index
    %c0_97 = arith.constant 0 : index
    %155 = vector.load %arg9[%c0_96, %c0_97] : memref<16x1xf32, #tpu.memory_space<vmem>>, vector<16x1xf32>
    %156 = vector.broadcast %155 : vector<16x1xf32> to vector<16x256xf32>
    %157 = arith.addf %154, %156 : vector<16x256xf32>
    %c0_98 = arith.constant 0 : index
    %c128_99 = arith.constant 128 : index
    %158 = vector.load %arg13[%c0_98, %c128_99] : memref<32x512xf32, #tpu.memory_space<vmem>>, vector<16x256xf32>
    tpu.vector_store %arg13[%c0_98, %c128_99], %157 {strides = array<i32>} : memref<32x512xf32, #tpu.memory_space<vmem>>, vector<16x256xf32>,
    %c0_100 = arith.constant 0 : index
    %c111_101 = arith.constant 111 : index
    %159 = vector.load %arg13[%c0_100, %c111_101] : memref<32x512xf32, #tpu.memory_space<vmem>>, vector<16x256xf32>
    %cst_102 = arith.constant 0.000000e+00 : f32
    %160 = vector.shape_cast %20 : vector<1x256xi1> to vector<1x256xi1>
    %161 = vector.broadcast %160 : vector<1x256xi1> to vector<16x256xi1>
    %162 = vector.broadcast %cst_102 : f32 to vector<16x256xf32>
    %163 = arith.select %161, %159, %162 : vector<16x256xi1>, vector<16x256xf32>
    %c0_103 = arith.constant 0 : index
    %c112_104 = arith.constant 112 : index
    %164 = vector.load %arg13[%c0_103, %c112_104] : memref<32x512xf32, #tpu.memory_space<vmem>>, vector<16x256xf32>
    %c0_105 = arith.constant 0 : index
    %c113_106 = arith.constant 113 : index
    %165 = vector.load %arg13[%c0_105, %c113_106] : memref<32x512xf32, #tpu.memory_space<vmem>>, vector<16x256xf32>
    %cst_107 = arith.constant 0.000000e+00 : f32
    %166 = vector.shape_cast %22 : vector<1x256xi1> to vector<1x256xi1>
    %167 = vector.broadcast %166 : vector<1x256xi1> to vector<16x256xi1>
    %168 = vector.broadcast %cst_107 : f32 to vector<16x256xf32>
    %169 = arith.select %167, %165, %168 : vector<16x256xi1>, vector<16x256xf32>
    %c0_108 = arith.constant 0 : index
    %c127_109 = arith.constant 127 : index
    %170 = vector.load %arg13[%c0_108, %c127_109] : memref<32x512xf32, #tpu.memory_space<vmem>>, vector<16x256xf32>
    %cst_110 = arith.constant 0.000000e+00 : f32
    %171 = vector.shape_cast %20 : vector<1x256xi1> to vector<1x256xi1>
    %172 = vector.broadcast %171 : vector<1x256xi1> to vector<16x256xi1>
    %173 = vector.broadcast %cst_110 : f32 to vector<16x256xf32>
    %174 = arith.select %172, %170, %173 : vector<16x256xi1>, vector<16x256xf32>
    %c0_111 = arith.constant 0 : index
    %c128_112 = arith.constant 128 : index
    %175 = vector.load %arg13[%c0_111, %c128_112] : memref<32x512xf32, #tpu.memory_space<vmem>>, vector<16x256xf32>
    %c0_113 = arith.constant 0 : index
    %c129_114 = arith.constant 129 : index
    %176 = vector.load %arg13[%c0_113, %c129_114] : memref<32x512xf32, #tpu.memory_space<vmem>>, vector<16x256xf32>
    %cst_115 = arith.constant 0.000000e+00 : f32
    %177 = vector.shape_cast %22 : vector<1x256xi1> to vector<1x256xi1>
    %178 = vector.broadcast %177 : vector<1x256xi1> to vector<16x256xi1>
    %179 = vector.broadcast %cst_115 : f32 to vector<16x256xf32>
    %180 = arith.select %178, %176, %179 : vector<16x256xi1>, vector<16x256xf32>
    %c0_116 = arith.constant 0 : index
    %c143_117 = arith.constant 143 : index
    %181 = vector.load %arg13[%c0_116, %c143_117] : memref<32x512xf32, #tpu.memory_space<vmem>>, vector<16x256xf32>
    %cst_118 = arith.constant 0.000000e+00 : f32
    %182 = vector.shape_cast %20 : vector<1x256xi1> to vector<1x256xi1>
    %183 = vector.broadcast %182 : vector<1x256xi1> to vector<16x256xi1>
    %184 = vector.broadcast %cst_118 : f32 to vector<16x256xf32>
    %185 = arith.select %183, %181, %184 : vector<16x256xi1>, vector<16x256xf32>
    %c0_119 = arith.constant 0 : index
    %c144_120 = arith.constant 144 : index
    %186 = vector.load %arg13[%c0_119, %c144_120] : memref<32x512xf32, #tpu.memory_space<vmem>>, vector<16x256xf32>
    %c0_121 = arith.constant 0 : index
    %c145_122 = arith.constant 145 : index
    %187 = vector.load %arg13[%c0_121, %c145_122] : memref<32x512xf32, #tpu.memory_space<vmem>>, vector<16x256xf32>
    %cst_123 = arith.constant 0.000000e+00 : f32
    %188 = vector.shape_cast %22 : vector<1x256xi1> to vector<1x256xi1>
    %189 = vector.broadcast %188 : vector<1x256xi1> to vector<16x256xi1>
    %190 = vector.broadcast %cst_123 : f32 to vector<16x256xf32>
    %191 = arith.select %189, %187, %190 : vector<16x256xi1>, vector<16x256xf32>
    %192 = tpu.concatenate %163, %164, %169, %174, %175, %180, %185, %186, %191 in 0 : vector<16x256xf32>, vector<16x256xf32>, vector<16x256xf32>, vector<16x256xf32>, vector<16x256xf32>, vector<16x256xf32>, vector<16x256xf32>, vector<16x256xf32>, vector<16x256xf32> -> vector<144x256xf32>
    %193 = arith.truncf %192 : vector<144x256xf32> to vector<144x256xbf16>
    %c0_124 = arith.constant 0 : index
    %c0_125 = arith.constant 0 : index
    %194 = vector.load %arg10[%c0_124, %c0_125] : memref<16x144xbf16, #tpu.memory_space<vmem>>, vector<16x144xbf16>
    %cst_126 = arith.constant dense<0.000000e+00> : vector<16x256xf32>
    %195 = tpu.matmul %194, %193, %cst_126 {dimension_numbers = #tpu.dot_dimension_numbers<[1], [0], [0], [1], [0, 0, 1, 1], [], []>} : vector<16x144xbf16>, vector<144x256xbf16>, vector<16x256xf32> -> vector<16x256xf32>
    %c0_127 = arith.constant 0 : index
    %c0_128 = arith.constant 0 : index
    %196 = vector.load %arg11[%c0_127, %c0_128] : memref<16x1xf32, #tpu.memory_space<vmem>>, vector<16x1xf32>
    %197 = vector.broadcast %196 : vector<16x1xf32> to vector<16x256xf32>
    %198 = arith.addf %195, %197 : vector<16x256xf32>
    %199 = arith.addf %116, %198 : vector<16x256xf32>
    %c0_129 = arith.constant 0 : index
    %c0_130 = arith.constant 0 : index
    %c0_131 = arith.constant 0 : index
    %200 = vector.load %arg12[%c0_129, %c0_130, %c0_131] : memref<1x16x256xf32, #tpu.memory_space<vmem>>, vector<1x16x256xf32>
    %201 = vector.shape_cast %200 : vector<1x16x256xf32> to vector<16x256xf32>
    %202 = vector.shape_cast %199 : vector<16x256xf32> to vector<1x16x256xf32>
    tpu.vector_store %arg12[%c0_129, %c0_130, %c0_131], %202 {strides = array<i32>} : memref<1x16x256xf32, #tpu.memory_space<vmem>>, vector<1x16x256xf32>,
    return
  }
  func.func @transform_0(%arg0: i32) -> (i32, i32, i32) {
    %c0_i32 = arith.constant 0 : i32
    %c0_i32_0 = arith.constant 0 : i32
    %c0_i32_1 = arith.constant 0 : i32
    return %arg0, %c0_i32, %c0_i32_0 : i32, i32, i32
  }
  func.func @transform_1(%arg0: i32) -> (i32, i32, i32) {
    %c0_i32 = arith.constant 0 : i32
    %c0_i32_0 = arith.constant 0 : i32
    %c0_i32_1 = arith.constant 0 : i32
    return %arg0, %c0_i32, %c0_i32_0 : i32, i32, i32
  }
  func.func @transform_2(%arg0: i32) -> (i32, i32, i32) {
    %c0_i32 = arith.constant 0 : i32
    %c0_i32_0 = arith.constant 0 : i32
    %c0_i32_1 = arith.constant 0 : i32
    return %arg0, %c0_i32, %c0_i32_0 : i32, i32, i32
  }
  func.func @transform_3(%arg0: i32) -> (i32, i32) {
    %c0_i32 = arith.constant 0 : i32
    %c0_i32_0 = arith.constant 0 : i32
    %c0_i32_1 = arith.constant 0 : i32
    return %c0_i32, %c0_i32_0 : i32, i32
  }
  func.func @transform_4(%arg0: i32) -> (i32, i32) {
    %c0_i32 = arith.constant 0 : i32
    %c0_i32_0 = arith.constant 0 : i32
    %c0_i32_1 = arith.constant 0 : i32
    return %c0_i32, %c0_i32_0 : i32, i32
  }
  func.func @transform_5(%arg0: i32) -> (i32, i32) {
    %c0_i32 = arith.constant 0 : i32
    %c0_i32_0 = arith.constant 0 : i32
    %c0_i32_1 = arith.constant 0 : i32
    return %c0_i32, %c0_i32_0 : i32, i32
  }
  func.func @transform_6(%arg0: i32) -> (i32, i32) {
    %c0_i32 = arith.constant 0 : i32
    %c0_i32_0 = arith.constant 0 : i32
    %c0_i32_1 = arith.constant 0 : i32
    return %c0_i32, %c0_i32_0 : i32, i32
  }
  func.func @transform_7(%arg0: i32) -> (i32, i32) {
    %c0_i32 = arith.constant 0 : i32
    %c0_i32_0 = arith.constant 0 : i32
    %c0_i32_1 = arith.constant 0 : i32
    return %c0_i32, %c0_i32_0 : i32, i32
  }
  func.func @transform_8(%arg0: i32) -> (i32, i32) {
    %c0_i32 = arith.constant 0 : i32
    %c0_i32_0 = arith.constant 0 : i32
    %c0_i32_1 = arith.constant 0 : i32
    return %c0_i32, %c0_i32_0 : i32, i32
  }
  func.func @transform_9(%arg0: i32) -> (i32, i32) {
    %c0_i32 = arith.constant 0 : i32
    %c0_i32_0 = arith.constant 0 : i32
    %c0_i32_1 = arith.constant 0 : i32
    return %c0_i32, %c0_i32_0 : i32, i32
  }
  func.func @transform_10(%arg0: i32) -> (i32, i32) {
    %c0_i32 = arith.constant 0 : i32
    %c0_i32_0 = arith.constant 0 : i32
    %c0_i32_1 = arith.constant 0 : i32
    return %c0_i32, %c0_i32_0 : i32, i32
  }
  func.func @transform_11(%arg0: i32) -> (i32, i32, i32) {
    %c0_i32 = arith.constant 0 : i32
    %c0_i32_0 = arith.constant 0 : i32
    %c0_i32_1 = arith.constant 0 : i32
    return %arg0, %c0_i32, %c0_i32_0 : i32, i32, i32
  }
}

</mosaic_0001>

<bundles_post_ra>
// kernel: modulation_forward.1
= control target key start
LH: loop header
LB: loop body
LE: loop exit
PB: predicated region body
PF: predicated region fallthrough
CT: control target
= control target key end

     0   :  { %s3095_s17 = smov 0   ;;  %s3810_s0 = inlined_call_operand.vmem [shape: f32[2,8,256], index: 0, kind: input, shape index: {}]   ;;  %s3811_s1 = inlined_call_operand.vmem [shape: f32[2,8,256], index: 1, kind: input, shape index: {}]   ;;  %s3812_s2 = inlined_call_operand.vmem [shape: f32[2,16,256], index: 2, kind: input, shape index: {}]   ;;  %s3813_s3 = inlined_call_operand.vmem [shape: bf16[32,144], index: 3, kind: input, shape index: {}]   ;;  %s3814_s4 = inlined_call_operand.vmem [shape: f32[32,1], index: 4, kind: input, shape index: {}]   ;;  %s3815_s5 = inlined_call_operand.vmem [shape: bf16[32,288], index: 5, kind: input, shape index: {}]   ;;  %s3816_s6 = inlined_call_operand.vmem [shape: f32[32,1], index: 6, kind: input, shape index: {}]   ;;  %s3817_s7 = inlined_call_operand.vmem [shape: bf16[16,144], index: 7, kind: input, shape index: {}]   ;;  %s3818_s8 = inlined_call_operand.vmem [shape: f32[16,1], index: 8, kind: input, shape index: {}]   ;;  %s3819_s9 = inlined_call_operand.vmem [shape: bf16[16,144], index: 9, kind: input, shape index: {}]   ;;  %s3820_s10 = inlined_call_operand.vmem [shape: f32[16,1], index: 10, kind: input, shape index: {}]   ;;  %s3821_s11 = inlined_call_operand.vmem [shape: f32[2,16,256], index: 11, kind: output, shape index: {}]  }
   0x1 LB: > { %s2142_s18 = sadd.s32 4294967295, %s3023_s17   ;;  %p2146_p0 = scmp.ge.s32.totalorder %s3023_s17, 1  ;;  %s3023_s17 = sphi %s3095_s17, %s21_s17  }
   0x2   : > { %p357_p1 = scmp.lt.s32.totalorder %s3023_s17, 3 }
   0x4   : > { %p358_p2 = pnand %p2146_p0, %p357_p1 }
   0x5   : > { %p407_p3 = scmp.lt.s32.totalorder (!%p358_p2), %s2142_s18, 1  ;;  %v3025_v0 = vmov (!%p358_p2), 0.0   ;;  %s3026_s19 = smov (!%p358_p2), 17   ;;  %v2999_v12 = vld [vmem:[%s3813_s3 + $0x4] ss:$8 sps:$4 sm:$0xff] (!%p358_p2)   ;;  %vm673_vm0 = vcmask (!%p358_p2), 130048   ;;  %v444_v18 = vlaneseq (!%p358_p2) }
   0x6   : > { %361 = sbr.rel (%p358_p2) target bundleno = 1607 (0x647), region = 64  ;;  %2396 = vrot.lane.b32.xlu1 (!%p358_p2), %v3025_v0, %s3026_s19  ;;  %s3027_s27 = smov (!%p358_p2), 16   ;;  %2195 = vmatprep.mubr.msk.bf16.mxu0 (!%p358_p2), %vm673_vm0, %v2999_v12  ;;  %v726_v13 = vld [vmem:[%s3814_s4 + $0x8] sm:$0xff] (!%p358_p2)  ;;  %v725_v14 = vld [vmem:[%s3814_s4] sm:$0xff] (!%p358_p2)  ;;  %v3034_v15 = vmov (!%p358_p2), 0   ;;  %v727_v16 = vld [vmem:[%s3814_s4 + $0x10] sm:$0xff] (!%p358_p2) }
   0x7   : > { %s3028_s28 = smov (!%p358_p2), 15   ;;  %s3029_s29 = smov (!%p358_p2), 1   ;;  %2516 = vset.pattern.permute.xlu1 (!%p358_p2), %v3034_v15  ;;  %2515 = vset.pattern.permute.xlu0 (!%p358_p2), %v3034_v15  ;;  %v728_v17 = vld [vmem:[%s3814_s4 + $0x18] sm:$0xff] (!%p358_p2)  ;;  %v445_v19 = vand.u32 (!%p358_p2), 127, %v444_v18  ;;  %vm515_vm1 = vcmask (!%p358_p2), 138240   ;;  %vm544_vm6 = vcmask (!%p358_p2), 121856  }
   0x8   : > { %s3030_s30 = smov (!%p358_p2), 127   ;;  %s3031_s12 = smov (!%p358_p2), 113   ;;  %vm569_vm10 = vcmask (!%p358_p2), 7168   ;;  %vm598_vm12 = vcmask (!%p358_p2), 1039360   ;;  %vm623_vm13 = vcmask (!%p358_p2), 924672   ;;  %vm694_vm14 = vcmask (!%p358_p2), 916480  }
   0x9   : > { %s3032_s13 = smov (!%p358_p2), 112   ;;  %s3033_s14 = smov (!%p358_p2), 111   ;;  %v446_v21 = vadd.s32 (!%p358_p2), 128, %v445_v19  ;;  %v451_v25 = vand.u32 (!%p358_p2), 15, %v445_v19  ;;  %vm648_vm15 = vcmask (!%p358_p2), 908288  }
   0xb   : > { %v458_v24 = vand.u32 (!%p358_p2), 15, %v446_v21  ;;  %vm471_vm3 = vcmp.ge.s32.totalorder (!%p358_p2), %v451_v25, 1  ;;  %vm473_vm9 = vcmp.le.s32.totalorder (!%p358_p2), %v451_v25, 14 }
   0xc   : > { %vm3194_vm5 = vmpackc.low (!%p358_p2), %vm471_vm3, %vm471_vm3 }
   0xd   : > { %s3831_s18 = smov (!%p407_p3, %s2142_s18), 1  ;;  %vm472_vm2 = vcmp.ge.s32.totalorder %v458_v24, 1  ;;  %vm474_vm7 = vcmp.le.s32.totalorder %v458_v24, 14  ;;  %vm3216_vm11 = vmpackc.low %vm473_vm9, %vm473_vm9 }
   0xe   : > { %s2357_s20 = sshll.u32 %s3831_s18, 4  ;;  %vm3189_vm4 = vmpackc.low %vm472_vm2, %vm472_vm2  ;;  %vm1348_vm2 = vcmask 261120   ;;  %s2359_s15 = sshll.u32 %s3831_s18, 5 }
   0xf   : > { %s411_s23 = scalar_lea.vmem %s3810_s0, %s2357_s20  ;;  %s416_s26 = scalar_lea.vmem %s3811_s1, %s2357_s20  ;;  %vm3208_vm8 = vmpackc.low %vm474_vm7, %vm474_vm7 }
  0x10   : > { %v3114_v1 = vld [vmem:[%s411_s23] sm:$0xff]  ;;  %v3116_v2 = vld [vmem:[%s411_s23 + $0x8] sm:$0xff]  ;;  %s421_s21 = scalar_lea.vmem %s3812_s2, %s2359_s15  ;;  %s426_s24 = scalar_lea.vmem %s3821_s11, %s2359_s15 }
  0x11   : > { %v3118_v3 = vld [vmem:[%s416_s26] sm:$0xff]  ;;  %v2400_v4 = vpack.i.bf16 %v3116_v2, %v3114_v1  ;;  %v3122_v5 = vld [vmem:[%s416_s26 + $0x8] sm:$0xff]  ;;  %v2455_v10 = vpack.i.bf16 %v3025_v0, %v3116_v2 }
  0x12   : > { %v2405_v6 = vpack.i.bf16 %v3122_v5, %v3118_v3  ;;  %v712_v7 = vpack.c.bf16 %v3122_v5, %v3116_v2  ;;  %v711_v8 = vpack.c.bf16 %v3118_v3, %v3114_v1  ;;  %v2460_v9 = vpack.i.bf16 %v3025_v0, %v3122_v5 }
  0x13   : > { %2401 = vrot.lane.b32.xlu0 %v2400_v4, %s3026_s19  ;;  %2411 = vrot.lane.b32.xlu1 %v2400_v4, %s3027_s27  ;;  %v2465_v11 = vpack.i.bf16 %v3118_v3, %v3114_v1 }
  0x17   : > { %2406 = vrot.lane.b32.xlu0 %v2405_v6, %s3026_s19  ;;  %2421 = vrot.lane.b32.xlu1 %v3025_v0, %s3027_s27 }
  0x1b   : > { %2416 = vrot.lane.b32.xlu0 %v2405_v6, %s3027_s27  ;;  %2431 = vrot.lane.b32.xlu1 %v2405_v6, %s3028_s28 }
  0x1f   : > { %2426 = vrot.lane.b32.xlu0 %v2400_v4, %s3028_s28  ;;  %2441 = vrot.lane.b32.xlu1 %v2400_v4, %s3029_s29 }
  0x23   : > { %2436 = vrot.lane.b32.xlu0 %v3025_v0, %s3028_s28  ;;  %2451 = vrot.lane.b32.xlu1 %v3025_v0, %s3029_s29 }
  0x27   : > { %2446 = vrot.lane.b32.xlu0 %v2405_v6, %s3029_s29  ;;  %2461 = vrot.lane.b32.xlu1 %v2460_v9, %s3030_s30 }
  0x2b   : > { %2456 = vrot.lane.b32.xlu0 %v2455_v10, %s3030_s30  ;;  %2471 = vrot.lane.b32.xlu1 %v2455_v10, %s3031_s12 }
  0x2f   : > { %2466 = vrot.lane.b32.xlu0 %v2465_v11, %s3030_s30  ;;  %2481 = vrot.lane.b32.xlu1 %v2465_v11, %s3031_s12 }
  0x33   : > { %2476 = vrot.lane.b32.xlu0 %v2460_v9, %s3031_s12  ;;  %2491 = vrot.lane.b32.xlu1 %v2460_v9, %s3032_s13 }
  0x37   : > { %2486 = vrot.lane.b32.xlu0 %v2455_v10, %s3032_s13  ;;  %2501 = vrot.lane.b32.xlu1 %v2455_v10, %s3033_s14 }
  0x3b   : > { %2496 = vrot.lane.b32.xlu0 %v2465_v11, %s3032_s13  ;;  %2511 = vrot.lane.b32.xlu1 %v2465_v11, %s3033_s14 }
  0x3f   : > { %2506 = vrot.lane.b32.xlu0 %v2460_v9, %s3033_s14  ;;  %736 = vperm.xlu1 %2516, %v726_v13  }
  0x43   : > { %731 = vperm.xlu0 %2515, %v725_v14   ;;  %741 = vperm.xlu1 %2516, %v727_v16  }
  0x47   : > { %746 = vperm.xlu0 %2515, %v728_v17   ;;  %2518 = vrot.lane.b32.xlu1 %v3025_v0, %s3026_s19 }
  0x4b   : > { %2523 = vrot.lane.b32.xlu0 %v3025_v0, %s3026_s19  ;;  %2528 = vrot.lane.b32.xlu1 %v3025_v0, %s3027_s27 }
  0x4f   : > { %2538 = vrot.lane.b32.xlu1 %v3025_v0, %s3028_s28  ;;  %2533 = vrot.lane.b32.xlu0 %v3025_v0, %s3027_s27 }
  0x78   : > { %v2397_v20 = vpop.permute.xlu1 %2396 }
  0x79   : > { %v2398_v26 = vunpack.i.l.bf16 %v2397_v20  ;;  %v2399_v31 = vunpack.i.h.bf16 %v2397_v20 }
  0x85   : > { %v2402_v22 = vpop.permute.xlu0 %2401  ;;  %v2412_v23 = vpop.permute.xlu1 %2411 }
  0x86   : > { %v2404_v27 = vunpack.i.h.bf16 %v2402_v22  ;;  %v2403_v28 = vunpack.i.l.bf16 %v2402_v22  ;;  %v2414_v34 = vunpack.i.h.bf16 %v2412_v23  ;;  %v2413_v35 = vunpack.i.l.bf16 %v2412_v23 }
  0x88   : > { %v517_v36 = vsel %vm515_vm1, %v2403_v28, %v2404_v27  ;;  %v516_v37 = vsel %vm515_vm1, %v2398_v26, %v2403_v28  ;;  %v675_v52 = vsel %vm673_vm0, %v2413_v35, %v2414_v34 }
  0x89   : > { %v2407_v29 = vpop.permute.xlu0 %2406  ;;  %v2422_v30 = vpop.permute.xlu1 %2421 }
  0x8a   : > { %v2409_v32 = vunpack.i.h.bf16 %v2407_v29  ;;  %v2408_v33 = vunpack.i.l.bf16 %v2407_v29  ;;  %v2424_v38 = vunpack.i.h.bf16 %v2422_v30  ;;  %v2423_v39 = vunpack.i.l.bf16 %v2422_v30 }
  0x8c   : > { %v519_v40 = vsel %vm515_vm1, %v2408_v33, %v2409_v32  ;;  %v518_v42 = vsel %vm515_vm1, %v2399_v31, %v2408_v33  ;;  %v674_v54 = vsel %vm673_vm0, %v2423_v39, %v2413_v35 }
  0x8d   : > { %v2417_v43 = vpop.permute.xlu0 %2416  ;;  %v2432_v44 = vpop.permute.xlu1 %2431  ;;  %v2160_v45 = vpack.c.bf16 %v519_v40, %v517_v36  ;;  %v2163_v47 = vpack.c.bf16 %v518_v42, %v516_v37 }
  0x8e   : > { %v2419_v48 = vunpack.i.h.bf16 %v2417_v43  ;;  %v2418_v49 = vunpack.i.l.bf16 %v2417_v43  ;;  %v2434_v50 = vunpack.i.h.bf16 %v2432_v44  ;;  %v2433_v51 = vunpack.i.l.bf16 %v2432_v44 }
  0x8f   : > { %2161 = vmatprep.subr.msk.bf16.mxu0 %vm3189_vm4, %v2160_v45 }
  0x90   : > { %2164 = vmatpush1.bf16.msk.msra.mxu0 %vm3194_vm5, %v2163_v47  ;;  %v677_v53 = vsel %vm673_vm0, %v2418_v49, %v2419_v48  ;;  %v676_v55 = vsel %vm673_vm0, %v2424_v38, %v2418_v49  ;;  %v548_v60 = vsel %vm544_vm6, %v2433_v51, %v2434_v50 }
  0x91   : > { %v2427_v56 = vpop.permute.xlu0 %2426  ;;  %v2442_v57 = vpop.permute.xlu1 %2441  ;;  %v706_v58 = vpack.c.bf16 %v677_v53, %v675_v52  ;;  %v705_v59 = vpack.c.bf16 %v676_v55, %v674_v54 }
  0x92   : > { %v2429_v61 = vunpack.i.h.bf16 %v2427_v56  ;;  %v2428_v62 = vunpack.i.l.bf16 %v2427_v56  ;;  %v2444_v13 = vunpack.i.h.bf16 %v2442_v57  ;;  %v2443_v14 = vunpack.i.l.bf16 %v2442_v57 }
  0x93   : > { %775 = vmatprep.subr.bf16.mxu0 %v706_v58 }
  0x94   : > { %v546_v63 = vsel %vm544_vm6, %v2428_v62, %v2429_v61  ;;  %776 = vmatpush1.bf16.msra.mxu0 %v705_v59  ;;  %v571_v26 = vsel %vm569_vm10, %v2443_v14, %v2444_v13 }
  0x95   : > { %v2437_v6 = vpop.permute.xlu0 %2436  ;;  %v2452_v9 = vpop.permute.xlu1 %2451  ;;  %v2166_v10 = vpack.c.bf16 %v548_v60, %v546_v63 }
  0x96   : > { %v2439_v11 = vunpack.i.h.bf16 %v2437_v6  ;;  %v2438_v12 = vunpack.i.l.bf16 %v2437_v6  ;;  %v2453_v16 = vunpack.i.l.bf16 %v2452_v9  ;;  %v2454_v19 = vunpack.i.h.bf16 %v2452_v9 }
  0x97   : > { %2167 = vmatprep.subr.msk.bf16.mxu0 %vm3208_vm8, %v2166_v10 }
  0x98   : > { %v547_v17 = vsel %vm544_vm6, %v2439_v11, %v2433_v51  ;;  %v545_v18 = vsel %vm544_vm6, %v2438_v12, %v2428_v62  ;;  %v570_v27 = vsel %vm569_vm10, %v2453_v16, %v2443_v14 }
  0x99   : > { %v2447_v21 = vpop.permute.xlu0 %2446  ;;  %v2462_v22 = vpop.permute.xlu1 %2461  ;;  %v2169_v23 = vpack.c.bf16 %v547_v17, %v545_v18 }
  0x9a   : > { %v2449_v24 = vunpack.i.h.bf16 %v2447_v21  ;;  %v2448_v25 = vunpack.i.l.bf16 %v2447_v21  ;;  %v2464_v30 = vunpack.i.h.bf16 %v2462_v22  ;;  %v2463_v31 = vunpack.i.l.bf16 %v2462_v22 }
  0x9b   : > { %2170 = vmatpush1.bf16.msk.msra.mxu0 %vm3216_vm11, %v2169_v23 }
  0x9c   : > { %v572_v28 = vsel %vm569_vm10, %v2454_v19, %v2448_v25  ;;  %v573_v29 = vsel %vm569_vm10, %v2448_v25, %v2449_v24  ;;  %v602_v38 = vsel %vm598_vm12, %v2463_v31, %v2464_v30 }
  0x9d   : > { %v2457_v32 = vpop.permute.xlu0 %2456  ;;  %v2472_v33 = vpop.permute.xlu1 %2471  ;;  %v2172_v34 = vpack.c.bf16 %v573_v29, %v571_v26  ;;  %v2175_v35 = vpack.c.bf16 %v572_v28, %v570_v27 }
  0x9e   : > { %v2459_v36 = vunpack.i.h.bf16 %v2457_v32  ;;  %v2458_v37 = vunpack.i.l.bf16 %v2457_v32  ;;  %v2474_v45 = vunpack.i.h.bf16 %v2472_v33  ;;  %v2473_v47 = vunpack.i.l.bf16 %v2472_v33  ;;  %v2997_v33 = vld [vmem:[%s3813_s3] ss:$8 sps:$4 sm:$0xff]  }
  0x9f   : > { %2173 = vmatprep.subr.msk.bf16.mxu0 %vm3189_vm4, %v2172_v34  ;;  %v3000_v34 = vld [vmem:[%s3813_s3 + $0x14] ss:$8 sps:$4 sm:$0xff]  }
  0xa0   : > { %v600_v39 = vsel %vm598_vm12, %v2458_v37, %v2459_v36  ;;  %2176 = vmatpush1.bf16.msk.msra.mxu0 %vm3194_vm5, %v2175_v35  ;;  %v625_v57 = vsel %vm623_vm13, %v2473_v47, %v2474_v45  ;;  %v3002_v35 = vld [vmem:[%s3813_s3 + $0x10] ss:$8 sps:$4 sm:$0xff]  }
  0xa1   : > { %v2467_v40 = vpop.permute.xlu0 %2466  ;;  %v2482_v42 = vpop.permute.xlu1 %2481  ;;  %781 = vmatprep.subr.bf16.mxu0 %v712_v7  ;;  %v2178_v48 = vpack.c.bf16 %v602_v38, %v600_v39 }
  0xa2   : > { %v2469_v43 = vunpack.i.h.bf16 %v2467_v40  ;;  %v2468_v44 = vunpack.i.l.bf16 %v2467_v40  ;;  %v2484_v51 = vunpack.i.h.bf16 %v2482_v42  ;;  %v2483_v52 = vunpack.i.l.bf16 %v2482_v42 }
  0xa4   : > { %v601_v49 = vsel %vm598_vm12, %v2469_v43, %v2463_v31  ;;  %v599_v50 = vsel %vm598_vm12, %v2468_v44, %v2458_v37  ;;  %782 = vmatpush1.bf16.msra.mxu0 %v711_v8  ;;  %v624_v58 = vsel %vm623_vm13, %v2483_v52, %v2473_v47 }
  0xa5   : > { %v2477_v53 = vpop.permute.xlu0 %2476  ;;  %2179 = vmatprep.subr.msk.bf16.mxu0 %vm3208_vm8, %v2178_v48  ;;  %v2492_v2 = vpop.permute.xlu1 %2491  ;;  %v2181_v5 = vpack.c.bf16 %v601_v49, %v599_v50 }
  0xa6   : > { %v2479_v7 = vunpack.i.h.bf16 %v2477_v53  ;;  %v2478_v54 = vunpack.i.l.bf16 %v2477_v53  ;;  %v2494_v55 = vunpack.i.h.bf16 %v2492_v2  ;;  %v2493_v56 = vunpack.i.l.bf16 %v2492_v2 }
  0xa8   : > { %v626_v59 = vsel %vm623_vm13, %v2484_v51, %v2478_v54  ;;  %v627_v1 = vsel %vm623_vm13, %v2478_v54, %v2479_v7  ;;  %2182 = vmatpush1.bf16.msk.msra.mxu0 %vm3216_vm11, %v2181_v5  ;;  %v698_v6 = vsel %vm694_vm14, %v2493_v56, %v2494_v55 }
  0xa9   : > { %v2487_v3 = vpop.permute.xlu0 %2486  ;;  %v2502_v8 = vpop.permute.xlu1 %2501  ;;  %v2184_v60 = vpack.c.bf16 %v627_v1, %v625_v57  ;;  %v2187_v61 = vpack.c.bf16 %v626_v59, %v624_v58 }
  0xaa   : > { %v2489_v62 = vunpack.i.h.bf16 %v2487_v3  ;;  %v2488_v63 = vunpack.i.l.bf16 %v2487_v3  ;;  %v2504_v16 = vunpack.i.h.bf16 %v2502_v8  ;;  %v2503_v17 = vunpack.i.l.bf16 %v2502_v8 }
  0xab   : > { %2185 = vmatprep.subr.msk.bf16.mxu0 %vm3189_vm4, %v2184_v60 }
  0xac   : > { %2188 = vmatpush1.bf16.msk.msra.mxu0 %vm3194_vm5, %v2187_v61  ;;  %v696_v9 = vsel %vm694_vm14, %v2488_v63, %v2489_v62  ;;  %v650_v27 = vsel %vm648_vm15, %v2503_v17, %v2504_v16 }
  0xad   : > { %v2497_v10 = vpop.permute.xlu0 %2496  ;;  %v2512_v11 = vpop.permute.xlu1 %2511  ;;  %v718_v12 = vpack.c.bf16 %v698_v6, %v696_v9 }
  0xae   : > { %v2499_v13 = vunpack.i.h.bf16 %v2497_v10  ;;  %v2498_v14 = vunpack.i.l.bf16 %v2497_v10  ;;  %v2514_v18 = vunpack.i.h.bf16 %v2512_v11  ;;  %v2513_v19 = vunpack.i.l.bf16 %v2512_v11  ;;  %v3005_v10 = vld [vmem:[%s3815_s5 + $0x4] ss:$12 sps:$4 sm:$0xff]  }
  0xaf   : > { %787 = vmatprep.subr.bf16.mxu0 %v718_v12  ;;  %1387 = vmatprep.mubr.bf16.mxu1 %v3005_v10  ;;  %v1294_v11 = vld [vmem:[%s3816_s6] sm:$0xff]  ;;  %v1296_v12 = vld [vmem:[%s3816_s6 + $0x10] sm:$0xff] }
  0xb0   : > { %v695_v21 = vsel %vm694_vm14, %v2498_v14, %v2488_v63  ;;  %v697_v22 = vsel %vm694_vm14, %v2499_v13, %v2493_v56  ;;  %v649_v28 = vsel %vm648_vm15, %v2513_v19, %v2503_v17  ;;  %v1295_v13 = vld [vmem:[%s3816_s6 + $0x8] sm:$0xff]  ;;  %v1297_v14 = vld [vmem:[%s3816_s6 + $0x18] sm:$0xff] }
  0xb1   : > { %v2507_v23 = vpop.permute.xlu0 %2506  ;;  %v717_v24 = vpack.c.bf16 %v697_v22, %v695_v21 }
  0xb2   : > { %v2509_v25 = vunpack.i.h.bf16 %v2507_v23  ;;  %v2508_v26 = vunpack.i.l.bf16 %v2507_v23 }
  0xb3   : > { %788 = vmatpush1.bf16.msra.mxu0 %v717_v24 }
  0xb4   : > { %v651_v29 = vsel %vm648_vm15, %v2514_v18, %v2508_v26  ;;  %v652_v30 = vsel %vm648_vm15, %v2508_v26, %v2509_v25 }
  0xb5   : > { %v2190_v31 = vpack.c.bf16 %v652_v30, %v650_v27  ;;  %v2193_v32 = vpack.c.bf16 %v651_v29, %v649_v28 }
  0xb7   : > { %2191 = vmatprep.subr.msk.bf16.mxu0 %vm3208_vm8, %v2190_v31 }
  0xb8   : > { %2194 = vmatpush1.bf16.msk.msra.mxu0 %vm3216_vm11, %v2193_v32 }
  0xbb   : > { %806 = vmatmul.mubr.bf16.vlgmr.msra.gmra.mrb[0].mxu0 %v2997_v33 }
  0xbc   : > { %2196 = vmatprep.mubr.msk.bf16.mxu0 %vm673_vm0, %v3000_v34 }
  0xbe   : > { %v737_v40 = vpop.permute.xlu1 %736 }
  0xc2   : > { %v732_v36 = vpop.permute.xlu0 %731  ;;  %v742_v51 = vpop.permute.xlu1 %741 }
  0xc3   : > { %816 = vmatmul.mubr.bf16.gmra.mrb[4].mxu0 %v3002_v35 }
  0xc6   : > { %v747_v54 = vpop.permute.xlu0 %746  ;;  %v2519_v16 = vpop.permute.xlu1 %2518 }
  0xc7   : > { %v2521_v26 = vunpack.i.h.bf16 %v2519_v16  ;;  %v2520_v27 = vunpack.i.l.bf16 %v2519_v16 }
  0xca   : > { %v3383_v17 = vpop.permute.xlu1 %2528  ;;  %v2524_v18 = vpop.permute.xlu0 %2523 }
  0xcb   : > { %v2531_v10 = vunpack.i.h.bf16 %v3383_v17 }
  0xce   : > { %v3385_v19 = vpop.permute.xlu1 %2538  ;;  %v3387_v21 = vpop.permute.xlu0 %2533 }
 0x18e   : > { %v807_v37 = vpop.f32.mrb[0].mxu0 }
 0x18f   : > { %v3278_v38 = vadd.f32 %v807_v37, %v732_v36  ;;  %v809_v39 = vpop.f32.mrb[1].mxu0 }
 0x190   : > { %v3280_v42 = vadd.f32 %v809_v39, %v732_v36  ;;  %v811_v43 = vpop.f32.mrb[2].mxu0 }
 0x191   : > { %v3282_v44 = vadd.f32 %v811_v43, %v737_v40  ;;  %v813_v45 = vpop.f32.mrb[3].mxu0 }
 0x192   : > { %v3284_v47 = vadd.f32 %v813_v45, %v737_v40  ;;  %v2542_v48 = vpack.i.bf16 %v3280_v42, %v3278_v38  ;;  %v2632_v62 = vpack.i.bf16 %v3025_v0, %v3280_v42 }
 0x193   : > { %v2647_v49 = vpack.i.bf16 %v3282_v44, %v3278_v38  ;;  %v1266_v7 = vpack.c.bf16 %v3282_v44, %v3278_v38 }
 0x194   : > { %2543 = vrot.lane.b32.xlu1 %v2542_v48, %s3026_s19  ;;  %v2557_v50 = vpack.i.bf16 %v3284_v47, %v3282_v44  ;;  %v1267_v5 = vpack.c.bf16 %v3284_v47, %v3280_v42  ;;  %v2637_v63 = vpack.i.bf16 %v3025_v0, %v3284_v47 }
 0x196   : > { %v817_v52 = vpop.f32.mrb[4].mxu0  ;;  %2558 = vrot.lane.b32.xlu0 %v2557_v50, %s3026_s19 }
 0x197   : > { %v3294_v53 = vadd.f32 %v817_v52, %v742_v51  ;;  %v819_v2 = vpop.f32.mrb[5].mxu0  ;;  %v2525_v52 = vunpack.i.l.bf16 %v2524_v18 }
 0x198   : > { %v3300_v55 = vadd.f32 %v819_v2, %v742_v51  ;;  %v821_v56 = vpop.f32.mrb[6].mxu0  ;;  %2548 = vrot.lane.b32.xlu1 %v2542_v48, %s3027_s27  ;;  %v2526_v51 = vunpack.i.h.bf16 %v2524_v18 }
 0x199   : > { %v3303_v57 = vadd.f32 %v821_v56, %v747_v54  ;;  %v823_v58 = vpop.f32.mrb[7].mxu0 }
 0x19a   : > { %v3305_v59 = vadd.f32 %v823_v58, %v747_v54  ;;  %2563 = vrot.lane.b32.xlu0 %v2557_v50, %s3027_s27  ;;  %v2572_v1 = vpack.i.bf16 %v3300_v55, %v3294_v53  ;;  %v2652_v6 = vpack.i.bf16 %v3025_v0, %v3300_v55 }
 0x19b   : > { %v2657_v3 = vpack.i.bf16 %v3303_v57, %v3294_v53  ;;  %v1268_v61 = vpack.c.bf16 %v3303_v57, %v3294_v53 }
 0x19c   : > { %2553 = vrot.lane.b32.xlu1 %v2542_v48, %s3028_s28  ;;  %v2592_v8 = vpack.i.bf16 %v3305_v59, %v3303_v57  ;;  %v1269_v60 = vpack.c.bf16 %v3305_v59, %v3300_v55  ;;  %v2687_v9 = vpack.i.bf16 %v3025_v0, %v3305_v59 }
 0x19e   : > { %2568 = vrot.lane.b32.xlu0 %v2557_v50, %s3028_s28 }
 0x1a0   : > { %2593 = vrot.lane.b32.xlu1 %v2592_v8, %s3026_s19 }
 0x1a2   : > { %2573 = vrot.lane.b32.xlu0 %v2572_v1, %s3026_s19 }
 0x1a4   : > { %2598 = vrot.lane.b32.xlu1 %v2542_v48, %s3029_s29 }
 0x1a6   : > { %2578 = vrot.lane.b32.xlu0 %v3025_v0, %s3028_s28 }
 0x1a8   : > { %2608 = vrot.lane.b32.xlu1 %v2592_v8, %s3027_s27 }
 0x1aa   : > { %2583 = vrot.lane.b32.xlu0 %v2572_v1, %s3027_s27 }
 0x1ac   : > { %2613 = vrot.lane.b32.xlu1 %v3025_v0, %s3029_s29 }
 0x1ae   : > { %2588 = vrot.lane.b32.xlu0 %v2572_v1, %s3028_s28 }
 0x1b0   : > { %2628 = vrot.lane.b32.xlu1 %v2592_v8, %s3028_s28 }
 0x1b2   : > { %2603 = vrot.lane.b32.xlu0 %v2557_v50, %s3029_s29 }
 0x1b4   : > { %2633 = vrot.lane.b32.xlu1 %v2632_v62, %s3030_s30 }
 0x1b6   : > { %2618 = vrot.lane.b32.xlu0 %v2572_v1, %s3029_s29 }
 0x1b8   : > { %2643 = vrot.lane.b32.xlu1 %v2592_v8, %s3029_s29 }
 0x1ba   : > { %2623 = vrot.lane.b32.xlu0 %v3025_v0, %s3029_s29 }
 0x1bc   : > { %2648 = vrot.lane.b32.xlu1 %v2647_v49, %s3030_s30 }
 0x1be   : > { %2638 = vrot.lane.b32.xlu0 %v2637_v63, %s3030_s30 }
 0x1c0   : > { %2663 = vrot.lane.b32.xlu1 %v2632_v62, %s3031_s12 }
 0x1c2   : > { %2653 = vrot.lane.b32.xlu0 %v2652_v6, %s3030_s30 }
 0x1c4   : > { %2673 = vrot.lane.b32.xlu1 %v2647_v49, %s3031_s12 }
 0x1c6   : > { %2658 = vrot.lane.b32.xlu0 %v2657_v3, %s3030_s30 }
 0x1c8   : > { %2688 = vrot.lane.b32.xlu1 %v2687_v9, %s3030_s30 }
 0x1ca   : > { %2668 = vrot.lane.b32.xlu0 %v2637_v63, %s3031_s12 }
 0x1cc   : > { %2693 = vrot.lane.b32.xlu1 %v2632_v62, %s3032_s13 }
 0x1ce   : > { %2678 = vrot.lane.b32.xlu0 %v2652_v6, %s3031_s12 }
 0x1d0   : > { %2703 = vrot.lane.b32.xlu1 %v2687_v9, %s3031_s12 }
 0x1d2   : > { %2683 = vrot.lane.b32.xlu0 %v2657_v3, %s3031_s12 }
 0x1d4   : > { %2708 = vrot.lane.b32.xlu1 %v2647_v49, %s3032_s13 }
 0x1d6   : > { %2698 = vrot.lane.b32.xlu0 %v2637_v63, %s3032_s13 }
 0x1d8   : > { %2718 = vrot.lane.b32.xlu1 %v2687_v9, %s3032_s13 }
 0x1da   : > { %2713 = vrot.lane.b32.xlu0 %v2652_v6, %s3032_s13 }
 0x1dc   : > { %2728 = vrot.lane.b32.xlu1 %v2632_v62, %s3033_s14 }
 0x1de   : > { %2723 = vrot.lane.b32.xlu0 %v2657_v3, %s3032_s13 }
 0x1e0   : > { %2738 = vrot.lane.b32.xlu1 %v2647_v49, %s3033_s14 }
 0x1e2   : > { %2733 = vrot.lane.b32.xlu0 %v2637_v63, %s3033_s14 }
 0x1e4   : > { %2748 = vrot.lane.b32.xlu1 %v2687_v9, %s3033_s14 }
 0x1e6   : > { %2743 = vrot.lane.b32.xlu0 %v2652_v6, %s3033_s14 }
 0x1e8   : > { %1300 = vperm.xlu1 %2516, %v1294_v11  }
 0x1ea   : > { %2753 = vrot.lane.b32.xlu0 %v2657_v3, %s3033_s14 }
 0x1ec   : > { %1310 = vperm.xlu1 %2516, %v1296_v12  }
 0x1ee   : > { %1305 = vperm.xlu0 %2515, %v1295_v13  }
 0x1f0   : > { %2758 = vrot.lane.b32.xlu1 %v3025_v0, %s3026_s19 }
 0x1f2   : > { %1315 = vperm.xlu0 %2515, %v1297_v14   ;;  %v2530_v14 = vunpack.i.l.bf16 %v3383_v17  ;;  %v2535_v17 = vunpack.i.l.bf16 %v3387_v21 }
 0x1f4   : > { %2768 = vrot.lane.b32.xlu1 %v3025_v0, %s3028_s28 }
 0x1f6   : > { %2763 = vrot.lane.b32.xlu0 %v3025_v0, %s3027_s27 }
 0x206   : > { %v2544_v22 = vpop.permute.xlu1 %2543 }
 0x207   : > { %v2546_v23 = vunpack.i.h.bf16 %v2544_v22  ;;  %v2545_v24 = vunpack.i.l.bf16 %v2544_v22 }
 0x208   : > { %v2559_v25 = vpop.permute.xlu0 %2558 }
 0x209   : > { %v2561_v28 = vunpack.i.h.bf16 %v2559_v25  ;;  %v2560_v29 = vunpack.i.l.bf16 %v2559_v25  ;;  %v883_v31 = vsel %vm515_vm1, %v2545_v24, %v2546_v23  ;;  %v882_v33 = vsel %vm515_vm1, %v2520_v27, %v2545_v24 }
 0x20a   : > { %v2549_v30 = vpop.permute.xlu1 %2548 }
 0x20b   : > { %v885_v32 = vsel %vm515_vm1, %v2560_v29, %v2561_v28  ;;  %v884_v34 = vsel %vm515_vm1, %v2521_v26, %v2560_v29  ;;  %v2551_v54 = vunpack.i.h.bf16 %v2549_v30  ;;  %v2550_v56 = vunpack.i.l.bf16 %v2549_v30 }
 0x20c   : > { %v2564_v35 = vpop.permute.xlu0 %2563  ;;  %v2204_v36 = vpack.c.bf16 %v885_v32, %v883_v31  ;;  %v2207_v37 = vpack.c.bf16 %v884_v34, %v882_v33  ;;  %v2536_v28 = vunpack.i.h.bf16 %v3387_v21 }
 0x20d   : > { %v2566_v43 = vunpack.i.h.bf16 %v2564_v35  ;;  %v2565_v45 = vunpack.i.l.bf16 %v2564_v35  ;;  %v1195_v16 = vsel %vm673_vm0, %v2550_v56, %v2551_v54  ;;  %v1194_v31 = vsel %vm673_vm0, %v2530_v14, %v2550_v56 }
 0x20e   : > { %v3393_v39 = vpop.permute.xlu1 %2553  ;;  %2205 = vmatprep.subr.msk.bf16.mxu1 %vm3189_vm4, %v2204_v36  ;;  %v2541_v36 = vunpack.i.h.bf16 %v3385_v19 }
 0x20f   : > { %2208 = vmatpush1.bf16.msk.msra.mxu1 %vm3194_vm5, %v2207_v37  ;;  %v1197_v8 = vsel %vm673_vm0, %v2565_v45, %v2566_v43  ;;  %v1196_v25 = vsel %vm673_vm0, %v2531_v10, %v2565_v45  ;;  %v2556_v29 = vunpack.i.h.bf16 %v3393_v39  ;;  %v2555_v32 = vunpack.i.l.bf16 %v3393_v39 }
 0x210   : > { %v2569_v40 = vpop.permute.xlu0 %2568  ;;  %v1255_v24 = vpack.c.bf16 %v1197_v8, %v1195_v16  ;;  %v1254_v35 = vpack.c.bf16 %v1196_v25, %v1194_v31 }
 0x211   : > { %v2571_v18 = vunpack.i.h.bf16 %v2569_v40  ;;  %v2570_v22 = vunpack.i.l.bf16 %v2569_v40 }
 0x212   : > { %v2594_v48 = vpop.permute.xlu1 %2593 }
 0x213   : > { %v2596_v49 = vunpack.i.h.bf16 %v2594_v48  ;;  %v2595_v50 = vunpack.i.l.bf16 %v2594_v48  ;;  %v933_v37 = vsel %vm544_vm6, %v2570_v22, %v2571_v18  ;;  %v932_v39 = vsel %vm544_vm6, %v2541_v36, %v2570_v22 }
 0x214   : > { %v2574_v2 = vpop.permute.xlu0 %2573 }
 0x215   : > { %v2576_v58 = vunpack.i.h.bf16 %v2574_v2  ;;  %v2575_v1 = vunpack.i.l.bf16 %v2574_v2  ;;  %v888_v62 = vsel %vm515_vm1, %v2526_v51, %v2595_v50  ;;  %v889_v63 = vsel %vm515_vm1, %v2595_v50, %v2596_v49 }
 0x216   : > { %v3399_v3 = vpop.permute.xlu1 %2598  ;;  %v2540_v49 = vunpack.i.l.bf16 %v3385_v19  ;;  %v931_v2 = vsel %vm544_vm6, %v2555_v32, %v2556_v29 }
 0x217   : > { %v886_v6 = vsel %vm515_vm1, %v2525_v52, %v2575_v1  ;;  %v887_v9 = vsel %vm515_vm1, %v2575_v1, %v2576_v58  ;;  %v2216_v1 = vpack.c.bf16 %v933_v37, %v931_v2  ;;  %v2601_v19 = vunpack.i.h.bf16 %v3399_v3 }
 0x218   : > { %v2210_v11 = vpack.c.bf16 %v889_v63, %v887_v9  ;;  %v2213_v12 = vpack.c.bf16 %v888_v62, %v886_v6  ;;  %v3407_v13 = vpop.permute.xlu0 %2578  ;;  %v930_v58 = vsel %vm544_vm6, %v2540_v49, %v2555_v32  ;;  %v2600_v9 = vunpack.i.l.bf16 %v3399_v3 }
 0x219   : > { %v2219_v62 = vpack.c.bf16 %v932_v39, %v930_v58  ;;  %v2581_v10 = vunpack.i.h.bf16 %v3407_v13 }
 0x21a   : > { %v2609_v23 = vpop.permute.xlu1 %2608  ;;  %2211 = vmatprep.subr.msk.bf16.mxu1 %vm3189_vm4, %v2210_v11 }
 0x21b   : > { %v2611_v26 = vunpack.i.h.bf16 %v2609_v23  ;;  %v2610_v27 = vunpack.i.l.bf16 %v2609_v23  ;;  %2214 = vmatpush1.bf16.msk.msra.mxu1 %vm3194_vm5, %v2213_v12  ;;  %v2580_v23 = vunpack.i.l.bf16 %v3407_v13 }
 0x21c   : > { %v2584_v30 = vpop.permute.xlu0 %2583  ;;  %1359 = vmatprep.subr.bf16.mxu1 %v1255_v24 }
 0x21d   : > { %v2586_v33 = vunpack.i.h.bf16 %v2584_v30  ;;  %v2585_v34 = vunpack.i.l.bf16 %v2584_v30  ;;  %v1201_v21 = vsel %vm673_vm0, %v2610_v27, %v2611_v26  ;;  %v1200_v48 = vsel %vm673_vm0, %v2536_v28, %v2610_v27 }
 0x21e   : > { %v2614_v40 = vpop.permute.xlu1 %2613  ;;  %v979_v28 = vsel %vm569_vm10, %v2600_v9, %v2601_v19 }
 0x21f   : > { %1360 = vmatpush1.bf16.msra.mxu1 %v1254_v35  ;;  %v1199_v43 = vsel %vm673_vm0, %v2585_v34, %v2586_v33  ;;  %v1198_v45 = vsel %vm673_vm0, %v2535_v17, %v2585_v34  ;;  %v2616_v11 = vunpack.i.h.bf16 %v2614_v40  ;;  %v2615_v3 = vunpack.i.l.bf16 %v2614_v40 }
 0x220   : > { %v2589_v50 = vpop.permute.xlu0 %2588  ;;  %v1257_v51 = vpack.c.bf16 %v1201_v21, %v1199_v43  ;;  %v1256_v52 = vpack.c.bf16 %v1200_v48, %v1198_v45 }
 0x221   : > { %v2591_v54 = vunpack.i.h.bf16 %v2589_v50  ;;  %v2590_v56 = vunpack.i.l.bf16 %v2589_v50  ;;  %v978_v35 = vsel %vm569_vm10, %v2615_v3, %v2600_v9 }
 0x222   : > { %v2629_v8 = vpop.permute.xlu1 %2628  ;;  %1361 = vmatprep.subr.bf16.mxu1 %v1257_v51 }
 0x223   : > { %v2631_v63 = vunpack.i.h.bf16 %v2629_v8  ;;  %v2630_v6 = vunpack.i.l.bf16 %v2629_v8  ;;  %1362 = vmatpush1.bf16.msra.mxu1 %v1256_v52  ;;  %v935_v14 = vsel %vm544_vm6, %v2590_v56, %v2591_v54  ;;  %v934_v17 = vsel %vm544_vm6, %v2580_v23, %v2590_v56 }
 0x224   : > { %v2604_v12 = vpop.permute.xlu0 %2603  ;;  %2217 = vmatprep.subr.msk.bf16.mxu1 %vm3208_vm8, %v2216_v1 }
 0x225   : > { %v937_v16 = vsel %vm544_vm6, %v2630_v6, %v2631_v63  ;;  %v2606_v18 = vunpack.i.h.bf16 %v2604_v12  ;;  %v2605_v22 = vunpack.i.l.bf16 %v2604_v12  ;;  %v936_v24 = vsel %vm544_vm6, %v2581_v10, %v2630_v6 }
 0x226   : > { %v2222_v25 = vpack.c.bf16 %v937_v16, %v935_v14  ;;  %v2634_v26 = vpop.permute.xlu1 %2633  ;;  %v2225_v30 = vpack.c.bf16 %v936_v24, %v934_v17 }
 0x227   : > { %v981_v27 = vsel %vm569_vm10, %v2605_v22, %v2606_v18  ;;  %2220 = vmatpush1.bf16.msk.msra.mxu1 %vm3216_vm11, %v2219_v62  ;;  %v980_v13 = vsel %vm569_vm10, %v2616_v11, %v2605_v22  ;;  %v2636_v62 = vunpack.i.h.bf16 %v2634_v26  ;;  %v2635_v63 = vunpack.i.l.bf16 %v2634_v26 }
 0x228   : > { %v2619_v29 = vpop.permute.xlu0 %2618  ;;  %2223 = vmatprep.subr.msk.bf16.mxu1 %vm3208_vm8, %v2222_v25  ;;  %v2228_v33 = vpack.c.bf16 %v981_v27, %v979_v28  ;;  %v2231_v40 = vpack.c.bf16 %v980_v13, %v978_v35 }
 0x229   : > { %v2621_v31 = vunpack.i.h.bf16 %v2619_v29  ;;  %v2620_v32 = vunpack.i.l.bf16 %v2619_v29  ;;  %v1051_v12 = vsel %vm598_vm12, %v2635_v63, %v2636_v62 }
 0x22a   : > { %v2644_v34 = vpop.permute.xlu1 %2643 }
 0x22b   : > { %v2646_v36 = vunpack.i.h.bf16 %v2644_v34  ;;  %v2645_v37 = vunpack.i.l.bf16 %v2644_v34  ;;  %2226 = vmatpush1.bf16.msk.msra.mxu1 %vm3216_vm11, %v2225_v30  ;;  %v983_v21 = vsel %vm569_vm10, %v2620_v32, %v2621_v31 }
 0x22c   : > { %v2624_v43 = vpop.permute.xlu0 %2623  ;;  %2229 = vmatprep.subr.msk.bf16.mxu1 %vm3189_vm4, %v2228_v33 }
 0x22d   : > { %v985_v45 = vsel %vm569_vm10, %v2645_v37, %v2646_v36  ;;  %v2626_v48 = vunpack.i.h.bf16 %v2624_v43  ;;  %v2625_v49 = vunpack.i.l.bf16 %v2624_v43 }
 0x22e   : > { %v2234_v39 = vpack.c.bf16 %v985_v45, %v983_v21  ;;  %v2649_v50 = vpop.permute.xlu1 %2648 }
 0x22f   : > { %v982_v51 = vsel %vm569_vm10, %v2625_v49, %v2620_v32  ;;  %v984_v52 = vsel %vm569_vm10, %v2626_v48, %v2645_v37  ;;  %2232 = vmatpush1.bf16.msk.msra.mxu1 %vm3194_vm5, %v2231_v40  ;;  %v2651_v19 = vunpack.i.h.bf16 %v2649_v50  ;;  %v2650_v9 = vunpack.i.l.bf16 %v2649_v50 }
 0x230   : > { %v2237_v2 = vpack.c.bf16 %v984_v52, %v982_v51  ;;  %v2639_v54 = vpop.permute.xlu0 %2638  ;;  %2235 = vmatprep.subr.msk.bf16.mxu1 %vm3189_vm4, %v2234_v39 }
 0x231   : > { %v2641_v58 = vunpack.i.h.bf16 %v2639_v54  ;;  %v2640_v1 = vunpack.i.l.bf16 %v2639_v54  ;;  %v1050_v18 = vsel %vm598_vm12, %v2650_v9, %v2635_v63 }
 0x232   : > { %v2664_v56 = vpop.permute.xlu1 %2663 }
 0x233   : > { %2238 = vmatpush1.bf16.msk.msra.mxu1 %vm3194_vm5, %v2237_v2  ;;  %v1053_v10 = vsel %vm598_vm12, %v2640_v1, %v2641_v58  ;;  %v1052_v42 = vsel %vm598_vm12, %v2651_v19, %v2640_v1  ;;  %v2666_v22 = vunpack.i.h.bf16 %v2664_v56  ;;  %v2665_v44 = vunpack.i.l.bf16 %v2664_v56 }
 0x234   : > { %v2654_v8 = vpop.permute.xlu0 %2653  ;;  %1371 = vmatprep.subr.bf16.mxu1 %v1267_v5  ;;  %v2240_v14 = vpack.c.bf16 %v1053_v10, %v1051_v12  ;;  %v2243_v38 = vpack.c.bf16 %v1052_v42, %v1050_v18 }
 0x235   : > { %v2656_v47 = vunpack.i.h.bf16 %v2654_v8  ;;  %v2655_v5 = vunpack.i.l.bf16 %v2654_v8  ;;  %v1099_v29 = vsel %vm623_vm13, %v2665_v44, %v2666_v22 }
 0x236   : > { %v2674_v6 = vpop.permute.xlu1 %2673 }
 0x237   : > { %1372 = vmatpush1.bf16.msra.mxu1 %v1266_v7  ;;  %v2676_v53 = vunpack.i.h.bf16 %v2674_v6  ;;  %v2675_v57 = vunpack.i.l.bf16 %v2674_v6 }
 0x238   : > { %v2659_v11 = vpop.permute.xlu0 %2658  ;;  %1373 = vmatprep.subr.bf16.mxu1 %v1269_v60  ;;  %v1055_v60 = vsel %vm598_vm12, %v2655_v5, %v2656_v47 }
 0x239   : > { %v2661_v7 = vunpack.i.h.bf16 %v2659_v11  ;;  %v2660_v55 = vunpack.i.l.bf16 %v2659_v11  ;;  %v1098_v37 = vsel %vm623_vm13, %v2675_v57, %v2665_v44 }
 0x23a   : > { %v2689_v16 = vpop.permute.xlu1 %2688 }
 0x23b   : > { %v2691_v23 = vunpack.i.h.bf16 %v2689_v16  ;;  %v2690_v24 = vunpack.i.l.bf16 %v2689_v16  ;;  %1374 = vmatpush1.bf16.msra.mxu1 %v1268_v61  ;;  %v1054_v30 = vsel %vm598_vm12, %v2660_v55, %v2655_v5 }
 0x23c   : > { %v2669_v59 = vpop.permute.xlu0 %2668  ;;  %2241 = vmatprep.subr.msk.bf16.mxu1 %vm3208_vm8, %v2240_v14 }
 0x23d   : > { %v1057_v25 = vsel %vm598_vm12, %v2690_v24, %v2691_v23  ;;  %v2671_v26 = vunpack.i.h.bf16 %v2669_v59  ;;  %v2670_v3 = vunpack.i.l.bf16 %v2669_v59  ;;  %v1056_v27 = vsel %vm598_vm12, %v2661_v7, %v2690_v24 }
 0x23e   : > { %v2246_v28 = vpack.c.bf16 %v1057_v25, %v1055_v60  ;;  %v2694_v17 = vpop.permute.xlu1 %2693  ;;  %v2249_v31 = vpack.c.bf16 %v1056_v27, %v1054_v30 }
 0x23f   : > { %v1101_v61 = vsel %vm623_vm13, %v2670_v3, %v2671_v26  ;;  %2244 = vmatpush1.bf16.msk.msra.mxu1 %vm3216_vm11, %v2243_v38  ;;  %v1100_v32 = vsel %vm623_vm13, %v2676_v53, %v2670_v3  ;;  %v2696_v51 = vunpack.i.h.bf16 %v2694_v17  ;;  %v2695_v52 = vunpack.i.l.bf16 %v2694_v17 }
 0x240   : > { %v2679_v13 = vpop.permute.xlu0 %2678  ;;  %2247 = vmatprep.subr.msk.bf16.mxu1 %vm3208_vm8, %v2246_v28  ;;  %v2252_v35 = vpack.c.bf16 %v1101_v61, %v1099_v29  ;;  %v2255_v21 = vpack.c.bf16 %v1100_v32, %v1098_v37 }
 0x241   : > { %v2681_v33 = vunpack.i.h.bf16 %v2679_v13  ;;  %v2680_v34 = vunpack.i.l.bf16 %v2679_v13  ;;  %v1235_v10 = vsel %vm694_vm14, %v2695_v52, %v2696_v51  ;;  %v3003_v13 = vld [vmem:[%s3815_s5] ss:$12 sps:$4 sm:$0xff]  }
 0x242   : > { %v2704_v36 = vpop.permute.xlu1 %2703 }
 0x243   : > { %v2706_v40 = vunpack.i.h.bf16 %v2704_v36  ;;  %v2705_v43 = vunpack.i.l.bf16 %v2704_v36  ;;  %2250 = vmatpush1.bf16.msk.msra.mxu1 %vm3216_vm11, %v2249_v31  ;;  %v1103_v48 = vsel %vm623_vm13, %v2680_v34, %v2681_v33 }
 0x244   : > { %v2684_v45 = vpop.permute.xlu0 %2683  ;;  %2253 = vmatprep.subr.msk.bf16.mxu1 %vm3189_vm4, %v2252_v35 }
 0x245   : > { %v1105_v49 = vsel %vm623_vm13, %v2705_v43, %v2706_v40  ;;  %v2686_v39 = vunpack.i.h.bf16 %v2684_v45  ;;  %v2685_v50 = vunpack.i.l.bf16 %v2684_v45 }
 0x246   : > { %v2258_v2 = vpack.c.bf16 %v1105_v49, %v1103_v48  ;;  %v2709_v54 = vpop.permute.xlu1 %2708 }
 0x247   : > { %v1102_v56 = vsel %vm623_vm13, %v2685_v50, %v2680_v34  ;;  %v1104_v58 = vsel %vm623_vm13, %v2686_v39, %v2705_v43  ;;  %v2710_v1 = vunpack.i.l.bf16 %v2709_v54  ;;  %2256 = vmatpush1.bf16.msk.msra.mxu1 %vm3194_vm5, %v2255_v21  ;;  %v2711_v63 = vunpack.i.h.bf16 %v2709_v54  ;;  %v3006_v34 = vld [vmem:[%s3815_s5 + $0x1c] ss:$12 sps:$4 sm:$0xff]  }
 0x248   : > { %v2261_v8 = vpack.c.bf16 %v1104_v58, %v1102_v56  ;;  %v2699_v62 = vpop.permute.xlu0 %2698  ;;  %2259 = vmatprep.subr.msk.bf16.mxu1 %vm3189_vm4, %v2258_v2  ;;  %v3008_v56 = vld [vmem:[%s3815_s5 + $0x18] ss:$12 sps:$4 sm:$0xff]  }
 0x249   : > { %v2701_v6 = vunpack.i.h.bf16 %v2699_v62  ;;  %v2700_v19 = vunpack.i.l.bf16 %v2699_v62  ;;  %v1234_v11 = vsel %vm694_vm14, %v2710_v1, %v2695_v52  ;;  %v3009_v62 = vld [vmem:[%s3815_s5 + $0x8] ss:$12 sps:$4 sm:$0xff]  }
 0x24a   : > { %v2719_v9 = vpop.permute.xlu1 %2718 }
 0x24b   : > { %v2721_v12 = vunpack.i.h.bf16 %v2719_v9  ;;  %v2720_v42 = vunpack.i.l.bf16 %v2719_v9  ;;  %2262 = vmatpush1.bf16.msk.msra.mxu1 %vm3194_vm5, %v2261_v8  ;;  %v1237_v47 = vsel %vm694_vm14, %v2700_v19, %v2701_v6  ;;  %v1236_v5 = vsel %vm694_vm14, %v2711_v63, %v2700_v19  ;;  %v3010_v63 = vld [vmem:[%s3815_s5 + $0x20] ss:$12 sps:$4 sm:$0xff]  }
 0x24c   : > { %v2714_v14 = vpop.permute.xlu0 %2713  ;;  %v1279_v16 = vpack.c.bf16 %v1237_v47, %v1235_v10  ;;  %v1278_v18 = vpack.c.bf16 %v1236_v5, %v1234_v11  ;;  %v479_v11 = vld [vmem:[%s421_s21] sm:$0xff]  ;;  %v480_v47 = vld [vmem:[%s421_s21 + $0x8] sm:$0xff] }
 0x24d   : > { %v2716_v22 = vunpack.i.h.bf16 %v2714_v14  ;;  %v2715_v23 = vunpack.i.l.bf16 %v2714_v14  ;;  %v1241_v44 = vsel %vm694_vm14, %v2720_v42, %v2721_v12 }
 0x24e   : > { %v2729_v24 = vpop.permute.xlu1 %2728  ;;  %1383 = vmatprep.subr.bf16.mxu1 %v1279_v16  ;;  %v481_v16 = vld [vmem:[%s421_s21 + $0x10] sm:$0xff] }
 0x24f   : > { %1384 = vmatpush1.bf16.msra.mxu1 %v1278_v18  ;;  %v1239_v38 = vsel %vm694_vm14, %v2715_v23, %v2716_v22  ;;  %v2731_v25 = vunpack.i.h.bf16 %v2729_v24  ;;  %v2730_v26 = vunpack.i.l.bf16 %v2729_v24 }
 0x250   : > { %v2724_v7 = vpop.permute.xlu0 %2723  ;;  %v1281_v55 = vpack.c.bf16 %v1241_v44, %v1239_v38 }
 0x251   : > { %v2726_v59 = vunpack.i.h.bf16 %v2724_v7  ;;  %v2725_v60 = vunpack.i.l.bf16 %v2724_v7  ;;  %v1147_v31 = vsel %vm648_vm15, %v2730_v26, %v2731_v25 }
 0x252   : > { %v2739_v3 = vpop.permute.xlu1 %2738  ;;  %1385 = vmatprep.subr.bf16.mxu1 %v1281_v55 }
 0x253   : > { %v2740_v27 = vunpack.i.l.bf16 %v2739_v3  ;;  %v1238_v28 = vsel %vm694_vm14, %v2725_v60, %v2715_v23  ;;  %v1240_v17 = vsel %vm694_vm14, %v2726_v59, %v2720_v42  ;;  %v2741_v61 = vunpack.i.h.bf16 %v2739_v3  ;;  %v482_v23 = vld [vmem:[%s421_s21 + $0x18] sm:$0xff] }
 0x254   : > { %v2734_v53 = vpop.permute.xlu0 %2733  ;;  %v1280_v57 = vpack.c.bf16 %v1240_v17, %v1238_v28 }
 0x255   : > { %v2736_v29 = vunpack.i.h.bf16 %v2734_v53  ;;  %v2735_v30 = vunpack.i.l.bf16 %v2734_v53  ;;  %v1146_v32 = vsel %vm648_vm15, %v2740_v27, %v2730_v26 }
 0x256   : > { %v2749_v33 = vpop.permute.xlu1 %2748  ;;  %1386 = vmatpush1.bf16.msra.mxu1 %v1280_v57 }
 0x257   : > { %v1148_v35 = vsel %vm648_vm15, %v2741_v61, %v2735_v30  ;;  %v1149_v36 = vsel %vm648_vm15, %v2735_v30, %v2736_v29  ;;  %v2751_v37 = vunpack.i.h.bf16 %v2749_v33  ;;  %v2750_v40 = vunpack.i.l.bf16 %v2749_v33 }
 0x258   : > { %v2264_v43 = vpack.c.bf16 %v1149_v36, %v1147_v31  ;;  %v2267_v21 = vpack.c.bf16 %v1148_v35, %v1146_v32  ;;  %v2744_v45 = vpop.permute.xlu0 %2743 }
 0x259   : > { %v2746_v48 = vunpack.i.h.bf16 %v2744_v45  ;;  %v2745_v49 = vunpack.i.l.bf16 %v2744_v45  ;;  %1388 = vmatmul.mubr.bf16.vlgmr.msra.gmra.mrb[0].mxu1 %v3003_v13  ;;  %v1153_v39 = vsel %vm648_vm15, %v2750_v40, %v2751_v37 }
 0x25a   : > { %2265 = vmatprep.subr.msk.bf16.mxu1 %vm3208_vm8, %v2264_v43  ;;  %1397 = vmatprep.mubr.bf16.mxu1 %v3006_v34  ;;  %v1697_v43 = vld [vmem:[%s3818_s8] sm:$0xff] }
 0x25b   : > { %v1151_v50 = vsel %vm648_vm15, %v2745_v49, %v2746_v48  ;;  %2268 = vmatpush1.bf16.msk.msra.mxu1 %vm3216_vm11, %v2267_v21  ;;  %v1698_v21 = vld [vmem:[%s3818_s8 + $0x8] sm:$0xff] }
 0x25c   : > { %v2270_v51 = vpack.c.bf16 %v1153_v39, %v1151_v50  ;;  %v2754_v52 = vpop.permute.xlu0 %2753 }
 0x25d   : > { %v2756_v2 = vunpack.i.h.bf16 %v2754_v52  ;;  %v2755_v54 = vunpack.i.l.bf16 %v2754_v52 }
 0x25e   : > { %2271 = vmatprep.subr.msk.bf16.mxu1 %vm3208_vm8, %v2270_v51 }
 0x25f   : > { %v1150_v58 = vsel %vm648_vm15, %v2755_v54, %v2745_v49  ;;  %v1152_v1 = vsel %vm648_vm15, %v2756_v2, %v2750_v40  ;;  %v3013_v40 = vld [vmem:[%s3817_s7 + $0x4] ss:$8 sps:$4 sm:$0xff]  }
 0x260   : > { %v2273_v8 = vpack.c.bf16 %v1152_v1, %v1150_v58  ;;  %2315 = vmatprep.mubr.msk.bf16.mxu0 %vm673_vm0, %v3013_v40 }
 0x261   : > { %1398 = vmatmul.mubr.bf16.gmra.mrb[4].mxu1 %v3008_v56 }
 0x262   : > { %2274 = vmatpush1.bf16.msk.msra.mxu1 %vm3216_vm11, %v2273_v8  ;;  %1440 = vmatprep.mubr.bf16.mxu1 %v3034_v15 }
 0x269   : > { %2275 = vmatmul.mubr.msk.bf16.vlgmr.msra.gmra.mrb[0].mxu1 %vm1348_vm2, %v3009_v62 }
 0x26a   : > { %1450 = vmatprep.mubr.bf16.mxu1 %v3034_v15  ;;  %v1301_v15 = vpop.permute.xlu1 %1300 }
 0x26d   : > { %v1306_v10 = vpop.permute.xlu0 %1305 }
 0x26e   : > { %v1311_v44 = vpop.permute.xlu1 %1310 }
 0x271   : > { %2276 = vmatmul.mubr.msk.bf16.gmra.mrb[4].mxu1 %vm1348_vm2, %v3010_v63  ;;  %v1316_v26 = vpop.permute.xlu0 %1315 }
 0x272   : > { %v2759_v45 = vpop.permute.xlu1 %2758 }
 0x273   : > { %v2761_v56 = vunpack.i.h.bf16 %v2759_v45  ;;  %v2760_v58 = vunpack.i.l.bf16 %v2759_v45 }
 0x275   : > { %v2764_v48 = vpop.permute.xlu0 %2763 }
 0x276   : > { %v2769_v49 = vpop.permute.xlu1 %2768 }
 0x33c   : > { %v1442_v6 = vpop.f32.mrb[0].mxu1 }
 0x33d   : > { %v2361_v19 = vadd.f32 %v1442_v6, %v1301_v15  ;;  %v1444_v9 = vpop.f32.mrb[1].mxu1 }
 0x33e   : > { %v2362_v12 = vadd.f32 %v1444_v9, %v1301_v15  ;;  %v1446_v42 = vpop.f32.mrb[2].mxu1 }
 0x33f   : > { %v2363_v5 = vadd.f32 %v1446_v42, %v1306_v10  ;;  %v1448_v14 = vpop.f32.mrb[3].mxu1  ;;  %v1461_v22 = vmul.f32 %v2361_v19, %v479_v11 }
 0x340   : > { %v2364_v18 = vadd.f32 %v1448_v14, %v1306_v10  ;;  %v1462_v24 = vmul.f32 %v2362_v12, %v480_v47 }
 0x341   : > { %v1463_v38 = vmul.f32 %v2363_v5, %v481_v16  ;;  %v1465_v60 = vadd.f32 %v1461_v22, %v479_v11  ;;  %v2765_v5 = vunpack.i.l.bf16 %v2764_v48 }
 0x342   : > { %v1464_v7 = vmul.f32 %v2364_v18, %v482_v23  ;;  %v1466_v27 = vadd.f32 %v1462_v24, %v480_v47  ;;  %v2766_v47 = vunpack.i.h.bf16 %v2764_v48 }
 0x343   : > { %v1467_v57 = vadd.f32 %v1463_v38, %v481_v16 }
 0x344   : > { %v1452_v55 = vpop.f32.mrb[4].mxu1  ;;  %v1468_v13 = vadd.f32 %v1464_v7, %v482_v23  ;;  %v2770_v7 = vunpack.i.l.bf16 %v2769_v49 }
 0x345   : > { %v2365_v59 = vadd.f32 %v1452_v55, %v1311_v44  ;;  %v1454_v25 = vpop.f32.mrb[5].mxu1 }
 0x346   : > { %v2366_v3 = vadd.f32 %v1454_v25, %v1311_v44  ;;  %v1456_v28 = vpop.f32.mrb[6].mxu1 }
 0x347   : > { %v3560_v17 = vadd.f32 %v2365_v59, %v1465_v60  ;;  %v2367_v53 = vadd.f32 %v1456_v28, %v1316_v26  ;;  %v1458_v61 = vpop.f32.mrb[7].mxu1 }
 0x348   : > { %v3562_v29 = vadd.f32 %v2366_v3, %v1466_v27  ;;  %v2368_v30 = vadd.f32 %v1458_v61, %v1316_v26  ;;  %v2771_v26 = vunpack.i.h.bf16 %v2769_v49 }
 0x349   : > { %v3564_v31 = vadd.f32 %v2367_v53, %v1467_v57 }
 0x34a   : > { %v3566_v32 = vadd.f32 %v2368_v30, %v1468_v13  ;;  %v2777_v33 = vpack.i.bf16 %v3562_v29, %v3560_v17  ;;  %v2812_v35 = vpack.i.bf16 %v3025_v0, %v3562_v29 }
 0x34b   : > { %v2822_v36 = vpack.i.bf16 %v3564_v31, %v3560_v17 }
 0x34c   : > { %2778 = vrot.lane.b32.xlu0 %v2777_v33, %s3027_s27  ;;  %2773 = vrot.lane.b32.xlu1 %v2777_v33, %s3026_s19  ;;  %v2787_v34 = vpack.i.bf16 %v3566_v32, %v3564_v31  ;;  %v2832_v37 = vpack.i.bf16 %v3025_v0, %v3566_v32 }
 0x350   : > { %2788 = vrot.lane.b32.xlu0 %v2787_v34, %s3026_s19  ;;  %2783 = vrot.lane.b32.xlu1 %v2777_v33, %s3028_s28 }
 0x354   : > { %2793 = vrot.lane.b32.xlu0 %v2777_v33, %s3029_s29  ;;  %2798 = vrot.lane.b32.xlu1 %v2787_v34, %s3027_s27 }
 0x358   : > { %2803 = vrot.lane.b32.xlu0 %v2787_v34, %s3028_s28  ;;  %2813 = vrot.lane.b32.xlu1 %v2812_v35, %s3030_s30 }
 0x35c   : > { %2808 = vrot.lane.b32.xlu0 %v3025_v0, %s3029_s29  ;;  %2818 = vrot.lane.b32.xlu1 %v2787_v34, %s3029_s29 }
 0x360   : > { %2828 = vrot.lane.b32.xlu0 %v2812_v35, %s3031_s12  ;;  %2823 = vrot.lane.b32.xlu1 %v2822_v36, %s3030_s30 }
 0x364   : > { %2833 = vrot.lane.b32.xlu0 %v2832_v37, %s3030_s30  ;;  %2843 = vrot.lane.b32.xlu1 %v2812_v35, %s3032_s13 }
 0x368   : > { %2838 = vrot.lane.b32.xlu0 %v2822_v36, %s3031_s12  ;;  %2848 = vrot.lane.b32.xlu1 %v2832_v37, %s3031_s12 }
 0x36c   : > { %2858 = vrot.lane.b32.xlu0 %v2832_v37, %s3032_s13  ;;  %2853 = vrot.lane.b32.xlu1 %v2822_v36, %s3032_s13 }
 0x370   : > { %2863 = vrot.lane.b32.xlu0 %v2812_v35, %s3033_s14  ;;  %2868 = vrot.lane.b32.xlu1 %v2832_v37, %s3033_s14 }
 0x374   : > { %2873 = vrot.lane.b32.xlu0 %v2822_v36, %s3033_s14  ;;  %1701 = vperm.xlu1 %2516, %v1697_v43  }
 0x378   : > { %1706 = vperm.xlu0 %2515, %v1698_v21   ;;  %2878 = vrot.lane.b32.xlu1 %v3025_v0, %s3026_s19 }
 0x37c   : > { %2883 = vrot.lane.b32.xlu0 %v3025_v0, %s3027_s27  ;;  %2888 = vrot.lane.b32.xlu1 %v3025_v0, %s3028_s28 }
 0x3be   : > { %v2779_v39 = vpop.permute.xlu0 %2778  ;;  %v2774_v50 = vpop.permute.xlu1 %2773 }
 0x3bf   : > { %v2776_v51 = vunpack.i.h.bf16 %v2774_v50  ;;  %v2775_v52 = vunpack.i.l.bf16 %v2774_v50  ;;  %v2781_v62 = vunpack.i.h.bf16 %v2779_v39  ;;  %v2780_v63 = vunpack.i.l.bf16 %v2779_v39 }
 0x3c1   : > { %v1501_v15 = vsel %vm515_vm1, %v2760_v58, %v2775_v52  ;;  %v1502_v6 = vsel %vm515_vm1, %v2775_v52, %v2776_v51  ;;  %v1649_v23 = vsel %vm673_vm0, %v2765_v5, %v2780_v63  ;;  %v1650_v38 = vsel %vm673_vm0, %v2780_v63, %v2781_v62 }
 0x3c2   : > { %v2789_v2 = vpop.permute.xlu0 %2788  ;;  %v2784_v54 = vpop.permute.xlu1 %2783 }
 0x3c3   : > { %v2791_v1 = vunpack.i.h.bf16 %v2789_v2  ;;  %v2790_v8 = vunpack.i.l.bf16 %v2789_v2  ;;  %v2786_v18 = vunpack.i.h.bf16 %v2784_v54  ;;  %v2785_v22 = vunpack.i.l.bf16 %v2784_v54 }
 0x3c4   : > { %v1686_v54 = vpack.c.bf16 %v3566_v32, %v3562_v29 }
 0x3c5   : > { %v1503_v19 = vsel %vm515_vm1, %v2761_v56, %v2790_v8  ;;  %v1504_v9 = vsel %vm515_vm1, %v2790_v8, %v2791_v1  ;;  %v1525_v28 = vsel %vm544_vm6, %v2770_v7, %v2785_v22  ;;  %v1526_v53 = vsel %vm544_vm6, %v2785_v22, %v2786_v18 }
 0x3c6   : > { %v2280_v10 = vpack.c.bf16 %v1504_v9, %v1502_v6  ;;  %v2283_v11 = vpack.c.bf16 %v1503_v19, %v1501_v15  ;;  %v2794_v12 = vpop.permute.xlu0 %2793  ;;  %v2799_v42 = vpop.permute.xlu1 %2798  ;;  %v1685_v19 = vpack.c.bf16 %v3564_v31, %v3560_v17 }
 0x3c7   : > { %v2801_v14 = vunpack.i.h.bf16 %v2799_v42  ;;  %v2800_v16 = vunpack.i.l.bf16 %v2799_v42  ;;  %v2796_v57 = vunpack.i.h.bf16 %v2794_v12  ;;  %v2795_v61 = vunpack.i.l.bf16 %v2794_v12 }
 0x3c8   : > { %2281 = vmatprep.subr.msk.bf16.mxu0 %vm3189_vm4, %v2280_v10 }
 0x3c9   : > { %v1651_v24 = vsel %vm673_vm0, %v2766_v47, %v2800_v16  ;;  %2284 = vmatpush1.bf16.msk.msra.mxu0 %vm3194_vm5, %v2283_v11  ;;  %v1652_v44 = vsel %vm673_vm0, %v2800_v16, %v2801_v14  ;;  %v1550_v45 = vsel %vm569_vm10, %v2795_v61, %v2796_v57 }
 0x3ca   : > { %v1679_v55 = vpack.c.bf16 %v1651_v24, %v1649_v23  ;;  %v2804_v59 = vpop.permute.xlu0 %2803  ;;  %v2814_v60 = vpop.permute.xlu1 %2813  ;;  %v1680_v25 = vpack.c.bf16 %v1652_v44, %v1650_v38 }
 0x3cb   : > { %v2806_v3 = vunpack.i.h.bf16 %v2804_v59  ;;  %v2805_v27 = vunpack.i.l.bf16 %v2804_v59  ;;  %v2816_v56 = vunpack.i.h.bf16 %v2814_v60  ;;  %v2815_v58 = vunpack.i.l.bf16 %v2814_v60 }
 0x3cc   : > { %1723 = vmatprep.subr.bf16.mxu0 %v1680_v25 }
 0x3cd   : > { %v1527_v30 = vsel %vm544_vm6, %v2771_v26, %v2805_v27  ;;  %v1528_v13 = vsel %vm544_vm6, %v2805_v27, %v2806_v3  ;;  %1724 = vmatpush1.bf16.msra.mxu0 %v1679_v55  ;;  %v1578_v11 = vsel %vm598_vm12, %v2815_v58, %v2816_v56 }
 0x3ce   : > { %v2286_v33 = vpack.c.bf16 %v1528_v13, %v1526_v53  ;;  %v2289_v34 = vpack.c.bf16 %v1527_v30, %v1525_v28  ;;  %v2809_v35 = vpop.permute.xlu0 %2808  ;;  %v2819_v36 = vpop.permute.xlu1 %2818 }
 0x3cf   : > { %v2811_v37 = vunpack.i.h.bf16 %v2809_v35  ;;  %v2810_v40 = vunpack.i.l.bf16 %v2809_v35  ;;  %v2821_v43 = vunpack.i.h.bf16 %v2819_v36  ;;  %v2820_v21 = vunpack.i.l.bf16 %v2819_v36 }
 0x3d0   : > { %2287 = vmatprep.subr.msk.bf16.mxu0 %vm3208_vm8, %v2286_v33 }
 0x3d1   : > { %v1549_v48 = vsel %vm569_vm10, %v2810_v40, %v2795_v61  ;;  %v1551_v49 = vsel %vm569_vm10, %v2811_v37, %v2820_v21  ;;  %v1552_v39 = vsel %vm569_vm10, %v2820_v21, %v2821_v43  ;;  %2290 = vmatpush1.bf16.msk.msra.mxu0 %vm3216_vm11, %v2289_v34 }
 0x3d2   : > { %v2292_v50 = vpack.c.bf16 %v1552_v39, %v1550_v45  ;;  %v2295_v51 = vpack.c.bf16 %v1551_v49, %v1549_v48  ;;  %v2829_v52 = vpop.permute.xlu0 %2828  ;;  %v2824_v2 = vpop.permute.xlu1 %2823 }
 0x3d3   : > { %v2825_v1 = vunpack.i.l.bf16 %v2824_v2  ;;  %v2826_v63 = vunpack.i.h.bf16 %v2824_v2  ;;  %v2831_v9 = vunpack.i.h.bf16 %v2829_v52  ;;  %v2830_v10 = vunpack.i.l.bf16 %v2829_v52 }
 0x3d4   : > { %2293 = vmatprep.subr.msk.bf16.mxu0 %vm3189_vm4, %v2292_v50 }
 0x3d5   : > { %2296 = vmatpush1.bf16.msk.msra.mxu0 %vm3194_vm5, %v2295_v51  ;;  %v1577_v12 = vsel %vm598_vm12, %v2825_v1, %v2815_v58  ;;  %v1602_v44 = vsel %vm623_vm13, %v2830_v10, %v2831_v9 }
 0x3d6   : > { %v2834_v8 = vpop.permute.xlu0 %2833  ;;  %v2844_v62 = vpop.permute.xlu1 %2843  ;;  %1729 = vmatprep.subr.bf16.mxu0 %v1686_v54 }
 0x3d7   : > { %v2836_v15 = vunpack.i.h.bf16 %v2834_v8  ;;  %v2835_v6 = vunpack.i.l.bf16 %v2834_v8  ;;  %v2846_v7 = vunpack.i.h.bf16 %v2844_v62  ;;  %v2845_v55 = vunpack.i.l.bf16 %v2844_v62  ;;  %v3011_v8 = vld [vmem:[%s3817_s7] ss:$8 sps:$4 sm:$0xff]  }
 0x3d9   : > { %v1579_v42 = vsel %vm598_vm12, %v2826_v63, %v2835_v6  ;;  %v1580_v47 = vsel %vm598_vm12, %v2835_v6, %v2836_v15  ;;  %1730 = vmatpush1.bf16.msra.mxu0 %v1685_v19  ;;  %v1670_v34 = vsel %vm694_vm14, %v2845_v55, %v2846_v7 }
 0x3da   : > { %v2298_v5 = vpack.c.bf16 %v1580_v47, %v1578_v11  ;;  %v2301_v14 = vpack.c.bf16 %v1579_v42, %v1577_v12  ;;  %v2839_v16 = vpop.permute.xlu0 %2838  ;;  %v2849_v18 = vpop.permute.xlu1 %2848 }
 0x3db   : > { %v2841_v22 = vunpack.i.h.bf16 %v2839_v16  ;;  %v2840_v23 = vunpack.i.l.bf16 %v2839_v16  ;;  %v2851_v24 = vunpack.i.h.bf16 %v2849_v18  ;;  %v2850_v38 = vunpack.i.l.bf16 %v2849_v18 }
 0x3dc   : > { %2299 = vmatprep.subr.msk.bf16.mxu0 %vm3208_vm8, %v2298_v5 }
 0x3dd   : > { %v1601_v59 = vsel %vm623_vm13, %v2840_v23, %v2830_v10  ;;  %v1603_v60 = vsel %vm623_vm13, %v2841_v22, %v2850_v38  ;;  %v1604_v25 = vsel %vm623_vm13, %v2850_v38, %v2851_v24  ;;  %2302 = vmatpush1.bf16.msk.msra.mxu0 %vm3216_vm11, %v2301_v14  ;;  %v3014_v24 = vld [vmem:[%s3819_s9 + $0x4] ss:$8 sps:$4 sm:$0xff]  }
 0x3de   : > { %v2304_v26 = vpack.c.bf16 %v1604_v25, %v1602_v44  ;;  %v2307_v3 = vpack.c.bf16 %v1603_v60, %v1601_v59  ;;  %v2859_v27 = vpop.permute.xlu0 %2858  ;;  %v2854_v28 = vpop.permute.xlu1 %2853  ;;  %v1989_v38 = vld [vmem:[%s3820_s10 + $0x8] sm:$0xff] }
 0x3df   : > { %v2861_v53 = vunpack.i.h.bf16 %v2859_v27  ;;  %v2860_v57 = vunpack.i.l.bf16 %v2859_v27  ;;  %v2856_v61 = vunpack.i.h.bf16 %v2854_v28  ;;  %v2855_v30 = vunpack.i.l.bf16 %v2854_v28 }
 0x3e0   : > { %2305 = vmatprep.subr.msk.bf16.mxu0 %vm3189_vm4, %v2304_v26 }
 0x3e1   : > { %v1671_v13 = vsel %vm694_vm14, %v2856_v61, %v2860_v57  ;;  %v1669_v33 = vsel %vm694_vm14, %v2855_v30, %v2845_v55  ;;  %2308 = vmatpush1.bf16.msk.msra.mxu0 %vm3194_vm5, %v2307_v3  ;;  %v1672_v35 = vsel %vm694_vm14, %v2860_v57, %v2861_v53 }
 0x3e2   : > { %v1691_v36 = vpack.c.bf16 %v1671_v13, %v1669_v33  ;;  %v2864_v37 = vpop.permute.xlu0 %2863  ;;  %v2869_v40 = vpop.permute.xlu1 %2868  ;;  %v1692_v43 = vpack.c.bf16 %v1672_v35, %v1670_v34 }
 0x3e3   : > { %v2866_v21 = vunpack.i.h.bf16 %v2864_v37  ;;  %v2865_v45 = vunpack.i.l.bf16 %v2864_v37  ;;  %v2871_v48 = vunpack.i.h.bf16 %v2869_v40  ;;  %v2870_v49 = vunpack.i.l.bf16 %v2869_v40 }
 0x3e4   : > { %1735 = vmatprep.subr.bf16.mxu0 %v1692_v43 }
 0x3e5   : > { %v1626_v39 = vsel %vm648_vm15, %v2865_v45, %v2866_v21  ;;  %v1628_v50 = vsel %vm648_vm15, %v2870_v49, %v2871_v48  ;;  %1736 = vmatpush1.bf16.msra.mxu0 %v1691_v36 }
 0x3e6   : > { %v2310_v51 = vpack.c.bf16 %v1628_v50, %v1626_v39  ;;  %v2874_v52 = vpop.permute.xlu0 %2873 }
 0x3e7   : > { %v2876_v2 = vunpack.i.h.bf16 %v2874_v52  ;;  %v2875_v54 = vunpack.i.l.bf16 %v2874_v52 }
 0x3e8   : > { %2311 = vmatprep.subr.msk.bf16.mxu0 %vm3208_vm8, %v2310_v51 }
 0x3e9   : > { %v1625_v56 = vsel %vm648_vm15, %v2875_v54, %v2865_v45  ;;  %v1627_v58 = vsel %vm648_vm15, %v2876_v2, %v2870_v49 }
 0x3ea   : > { %v2313_v1 = vpack.c.bf16 %v1627_v58, %v1625_v56 }
 0x3ec   : > { %2314 = vmatpush1.bf16.msk.msra.mxu0 %vm3216_vm11, %v2313_v1 }
 0x3ef   : > { %1754 = vmatmul.mubr.bf16.vlgmr.msra.gmra.mrb[8].mxu0 %v3011_v8 }
 0x3f0   : > { %2354 = vmatprep.mubr.msk.bf16.mxu0 %vm673_vm0, %v3014_v24 }
 0x3f3   : > { %v1702_v62 = vpop.permute.xlu1 %1701 }
 0x3f7   : > { %v1707_v19 = vpop.permute.xlu0 %1706  ;;  %v2879_v44 = vpop.permute.xlu1 %2878 }
 0x3f8   : > { %v2881_v28 = vunpack.i.h.bf16 %v2879_v44  ;;  %v2880_v53 = vunpack.i.l.bf16 %v2879_v44 }
 0x3fb   : > { %v2884_v7 = vpop.permute.xlu0 %2883  ;;  %v2889_v55 = vpop.permute.xlu1 %2888 }
 0x3fc   : > { %v2886_v45 = vunpack.i.h.bf16 %v2884_v7  ;;  %v2885_v48 = vunpack.i.l.bf16 %v2884_v7  ;;  %v2890_v58 = vunpack.i.l.bf16 %v2889_v55 }
 0x4c2   : > { %v1755_v63 = vpop.f32.mrb[8].mxu0 }
 0x4c3   : > { %v3679_v15 = vadd.f32 %v1755_v63, %v1702_v62  ;;  %v1757_v6 = vpop.f32.mrb[9].mxu0 }
 0x4c4   : > { %v3681_v9 = vadd.f32 %v1757_v6, %v1702_v62  ;;  %v1759_v10 = vpop.f32.mrb[10].mxu0  ;;  %v2891_v6 = vunpack.i.h.bf16 %v2889_v55 }
 0x4c5   : > { %v3683_v11 = vadd.f32 %v1759_v10, %v1707_v19  ;;  %v1761_v12 = vpop.f32.mrb[11].mxu0 }
 0x4c6   : > { %v3685_v42 = vadd.f32 %v1761_v12, %v1707_v19  ;;  %v2897_v47 = vpack.i.bf16 %v3681_v9, %v3679_v15  ;;  %v2932_v22 = vpack.i.bf16 %v3025_v0, %v3681_v9 }
 0x4c7   : > { %v2942_v5 = vpack.i.bf16 %v3683_v11, %v3679_v15  ;;  %v1976_v18 = vpack.c.bf16 %v3683_v11, %v3679_v15 }
 0x4c8   : > { %2898 = vrot.lane.b32.xlu0 %v2897_v47, %s3027_s27  ;;  %2893 = vrot.lane.b32.xlu1 %v2897_v47, %s3026_s19  ;;  %v2907_v14 = vpack.i.bf16 %v3685_v42, %v3683_v11  ;;  %v1977_v16 = vpack.c.bf16 %v3685_v42, %v3681_v9  ;;  %v2952_v23 = vpack.i.bf16 %v3025_v0, %v3685_v42 }
 0x4cc   : > { %2908 = vrot.lane.b32.xlu0 %v2907_v14, %s3026_s19  ;;  %2903 = vrot.lane.b32.xlu1 %v2897_v47, %s3028_s28 }
 0x4d0   : > { %2913 = vrot.lane.b32.xlu0 %v2897_v47, %s3029_s29  ;;  %2918 = vrot.lane.b32.xlu1 %v2907_v14, %s3027_s27 }
 0x4d4   : > { %2923 = vrot.lane.b32.xlu0 %v2907_v14, %s3028_s28  ;;  %2933 = vrot.lane.b32.xlu1 %v2932_v22, %s3030_s30 }
 0x4d8   : > { %2928 = vrot.lane.b32.xlu0 %v3025_v0, %s3029_s29  ;;  %2938 = vrot.lane.b32.xlu1 %v2907_v14, %s3029_s29  ;;  %v1988_v0 = vld [vmem:[%s3820_s10] sm:$0xff] }
 0x4dc   : > { %2948 = vrot.lane.b32.xlu0 %v2932_v22, %s3031_s12  ;;  %2943 = vrot.lane.b32.xlu1 %v2942_v5, %s3030_s30 }
 0x4e0   : > { %2953 = vrot.lane.b32.xlu0 %v2952_v23, %s3030_s30  ;;  %2963 = vrot.lane.b32.xlu1 %v2932_v22, %s3032_s13 }
 0x4e4   : > { %2958 = vrot.lane.b32.xlu0 %v2942_v5, %s3031_s12  ;;  %2968 = vrot.lane.b32.xlu1 %v2952_v23, %s3031_s12 }
 0x4e8   : > { %2978 = vrot.lane.b32.xlu0 %v2952_v23, %s3032_s13  ;;  %2973 = vrot.lane.b32.xlu1 %v2942_v5, %s3032_s13 }
 0x4ec   : > { %2983 = vrot.lane.b32.xlu0 %v2932_v22, %s3033_s14  ;;  %2988 = vrot.lane.b32.xlu1 %v2952_v23, %s3033_s14 }
 0x4f0   : > { %2993 = vrot.lane.b32.xlu0 %v2942_v5, %s3033_s14  ;;  %1992 = vperm.xlu1 %2516, %v1988_v0  }
 0x4f4   : > { %1997 = vperm.xlu0 %2515, %v1989_v38  }
 0x53a   : > { %v2899_v59 = vpop.permute.xlu0 %2898  ;;  %v2894_v60 = vpop.permute.xlu1 %2893 }
 0x53b   : > { %v2896_v25 = vunpack.i.h.bf16 %v2894_v60  ;;  %v2895_v26 = vunpack.i.l.bf16 %v2894_v60  ;;  %v2901_v30 = vunpack.i.h.bf16 %v2899_v59  ;;  %v2900_v13 = vunpack.i.l.bf16 %v2899_v59 }
 0x53d   : > { %v1792_v33 = vsel %vm515_vm1, %v2880_v53, %v2895_v26  ;;  %v1793_v34 = vsel %vm515_vm1, %v2895_v26, %v2896_v25  ;;  %v1940_v52 = vsel %vm673_vm0, %v2885_v48, %v2900_v13  ;;  %v1941_v54 = vsel %vm673_vm0, %v2900_v13, %v2901_v30 }
 0x53e   : > { %v2909_v3 = vpop.permute.xlu0 %2908  ;;  %v2904_v27 = vpop.permute.xlu1 %2903 }
 0x53f   : > { %v2911_v57 = vunpack.i.h.bf16 %v2909_v3  ;;  %v2910_v61 = vunpack.i.l.bf16 %v2909_v3  ;;  %v2906_v50 = vunpack.i.h.bf16 %v2904_v27  ;;  %v2905_v51 = vunpack.i.l.bf16 %v2904_v27 }
 0x541   : > { %v1794_v35 = vsel %vm515_vm1, %v2881_v28, %v2910_v61  ;;  %v1795_v36 = vsel %vm515_vm1, %v2910_v61, %v2911_v57  ;;  %v1816_v12 = vsel %vm544_vm6, %v2890_v58, %v2905_v51  ;;  %v1817_v47 = vsel %vm544_vm6, %v2905_v51, %v2906_v50 }
 0x542   : > { %v2319_v37 = vpack.c.bf16 %v1795_v36, %v1793_v34  ;;  %v2322_v40 = vpack.c.bf16 %v1794_v35, %v1792_v33  ;;  %v2914_v43 = vpop.permute.xlu0 %2913  ;;  %v2919_v21 = vpop.permute.xlu1 %2918 }
 0x543   : > { %v2921_v49 = vunpack.i.h.bf16 %v2919_v21  ;;  %v2920_v39 = vunpack.i.l.bf16 %v2919_v21  ;;  %v2916_v5 = vunpack.i.h.bf16 %v2914_v43  ;;  %v2915_v14 = vunpack.i.l.bf16 %v2914_v43 }
 0x544   : > { %2320 = vmatprep.subr.msk.bf16.mxu0 %vm3189_vm4, %v2319_v37 }
 0x545   : > { %v1942_v2 = vsel %vm673_vm0, %v2886_v45, %v2920_v39  ;;  %2323 = vmatpush1.bf16.msk.msra.mxu0 %vm3194_vm5, %v2322_v40  ;;  %v1943_v56 = vsel %vm673_vm0, %v2920_v39, %v2921_v49  ;;  %v1841_v25 = vsel %vm569_vm10, %v2915_v14, %v2916_v5 }
 0x546   : > { %v1970_v1 = vpack.c.bf16 %v1942_v2, %v1940_v52  ;;  %v2924_v8 = vpop.permute.xlu0 %2923  ;;  %v2934_v62 = vpop.permute.xlu1 %2933  ;;  %v1971_v63 = vpack.c.bf16 %v1943_v56, %v1941_v54 }
 0x547   : > { %v2926_v19 = vunpack.i.h.bf16 %v2924_v8  ;;  %v2925_v10 = vunpack.i.l.bf16 %v2924_v8  ;;  %v2936_v30 = vunpack.i.h.bf16 %v2934_v62  ;;  %v2935_v13 = vunpack.i.l.bf16 %v2934_v62 }
 0x548   : > { %2014 = vmatprep.subr.bf16.mxu0 %v1971_v63 }
 0x549   : > { %v1818_v22 = vsel %vm544_vm6, %v2891_v6, %v2925_v10  ;;  %v1819_v23 = vsel %vm544_vm6, %v2925_v10, %v2926_v19  ;;  %2015 = vmatpush1.bf16.msra.mxu0 %v1970_v1  ;;  %v1869_v45 = vsel %vm598_vm12, %v2935_v13, %v2936_v30 }
 0x54a   : > { %v2325_v24 = vpack.c.bf16 %v1819_v23, %v1817_v47  ;;  %v2328_v0 = vpack.c.bf16 %v1818_v22, %v1816_v12  ;;  %v2929_v38 = vpop.permute.xlu0 %2928  ;;  %v2939_v44 = vpop.permute.xlu1 %2938 }
 0x54b   : > { %v2931_v7 = vunpack.i.h.bf16 %v2929_v38  ;;  %v2930_v55 = vunpack.i.l.bf16 %v2929_v38  ;;  %v2941_v59 = vunpack.i.h.bf16 %v2939_v44  ;;  %v2940_v60 = vunpack.i.l.bf16 %v2939_v44 }
 0x54c   : > { %2326 = vmatprep.subr.msk.bf16.mxu0 %vm3208_vm8, %v2325_v24 }
 0x54d   : > { %v1840_v26 = vsel %vm569_vm10, %v2930_v55, %v2915_v14  ;;  %v1842_v3 = vsel %vm569_vm10, %v2931_v7, %v2940_v60  ;;  %v1843_v27 = vsel %vm569_vm10, %v2940_v60, %v2941_v59  ;;  %2329 = vmatpush1.bf16.msk.msra.mxu0 %vm3216_vm11, %v2328_v0 }
 0x54e   : > { %v2331_v28 = vpack.c.bf16 %v1843_v27, %v1841_v25  ;;  %v2334_v53 = vpack.c.bf16 %v1842_v3, %v1840_v26  ;;  %v2949_v57 = vpop.permute.xlu0 %2948  ;;  %v2944_v61 = vpop.permute.xlu1 %2943 }
 0x54f   : > { %v2945_v33 = vunpack.i.l.bf16 %v2944_v61  ;;  %v2946_v36 = vunpack.i.h.bf16 %v2944_v61  ;;  %v2951_v43 = vunpack.i.h.bf16 %v2949_v57  ;;  %v2950_v21 = vunpack.i.l.bf16 %v2949_v57  ;;  %v3016_v61 = vld [vmem:[%s3819_s9] ss:$8 sps:$4 sm:$0xff]  }
 0x550   : > { %2332 = vmatprep.subr.msk.bf16.mxu0 %vm3189_vm4, %v2331_v28 }
 0x551   : > { %2335 = vmatpush1.bf16.msk.msra.mxu0 %vm3194_vm5, %v2334_v53  ;;  %v1868_v48 = vsel %vm598_vm12, %v2945_v33, %v2935_v13  ;;  %v1893_v56 = vsel %vm623_vm13, %v2950_v21, %v2951_v43 }
 0x552   : > { %v2954_v34 = vpop.permute.xlu0 %2953  ;;  %v2964_v35 = vpop.permute.xlu1 %2963  ;;  %2020 = vmatprep.subr.bf16.mxu0 %v1977_v16 }
 0x553   : > { %v2956_v37 = vunpack.i.h.bf16 %v2954_v34  ;;  %v2955_v40 = vunpack.i.l.bf16 %v2954_v34  ;;  %v2966_v58 = vunpack.i.h.bf16 %v2964_v35  ;;  %v2965_v1 = vunpack.i.l.bf16 %v2964_v35 }
 0x555   : > { %v1870_v49 = vsel %vm598_vm12, %v2946_v36, %v2955_v40  ;;  %v1871_v39 = vsel %vm598_vm12, %v2955_v40, %v2956_v37  ;;  %2021 = vmatpush1.bf16.msra.mxu0 %v1976_v18  ;;  %v1961_v22 = vsel %vm694_vm14, %v2965_v1, %v2966_v58 }
 0x556   : > { %v2337_v50 = vpack.c.bf16 %v1871_v39, %v1869_v45  ;;  %v2340_v9 = vpack.c.bf16 %v1870_v49, %v1868_v48  ;;  %v2959_v42 = vpop.permute.xlu0 %2958  ;;  %v2969_v16 = vpop.permute.xlu1 %2968 }
 0x557   : > { %v2961_v51 = vunpack.i.h.bf16 %v2959_v42  ;;  %v2960_v52 = vunpack.i.l.bf16 %v2959_v42  ;;  %v2971_v2 = vunpack.i.h.bf16 %v2969_v16  ;;  %v2970_v54 = vunpack.i.l.bf16 %v2969_v16 }
 0x558   : > { %2338 = vmatprep.subr.msk.bf16.mxu0 %vm3208_vm8, %v2337_v50 }
 0x559   : > { %v1892_v8 = vsel %vm623_vm13, %v2960_v52, %v2950_v21  ;;  %v1894_v15 = vsel %vm623_vm13, %v2961_v51, %v2970_v54  ;;  %v1895_v11 = vsel %vm623_vm13, %v2970_v54, %v2971_v2  ;;  %2341 = vmatpush1.bf16.msk.msra.mxu0 %vm3216_vm11, %v2340_v9 }
 0x55a   : > { %v2343_v18 = vpack.c.bf16 %v1895_v11, %v1893_v56  ;;  %v2346_v62 = vpack.c.bf16 %v1894_v15, %v1892_v8  ;;  %v2979_v63 = vpop.permute.xlu0 %2978  ;;  %v2974_v6 = vpop.permute.xlu1 %2973 }
 0x55b   : > { %v2981_v19 = vunpack.i.h.bf16 %v2979_v63  ;;  %v2980_v10 = vunpack.i.l.bf16 %v2979_v63  ;;  %v2976_v12 = vunpack.i.h.bf16 %v2974_v6  ;;  %v2975_v47 = vunpack.i.l.bf16 %v2974_v6 }
 0x55c   : > { %2344 = vmatprep.subr.msk.bf16.mxu0 %vm3189_vm4, %v2343_v18 }
 0x55d   : > { %v1962_v5 = vsel %vm694_vm14, %v2976_v12, %v2980_v10  ;;  %v1960_v14 = vsel %vm694_vm14, %v2975_v47, %v2965_v1  ;;  %2347 = vmatpush1.bf16.msk.msra.mxu0 %vm3194_vm5, %v2346_v62  ;;  %v1963_v23 = vsel %vm694_vm14, %v2980_v10, %v2981_v19 }
 0x55e   : > { %v1982_v24 = vpack.c.bf16 %v1962_v5, %v1960_v14  ;;  %v2984_v0 = vpop.permute.xlu0 %2983  ;;  %v2989_v38 = vpop.permute.xlu1 %2988  ;;  %v1983_v44 = vpack.c.bf16 %v1963_v23, %v1961_v22 }
 0x55f   : > { %v2986_v7 = vunpack.i.h.bf16 %v2984_v0  ;;  %v2985_v55 = vunpack.i.l.bf16 %v2984_v0  ;;  %v2991_v59 = vunpack.i.h.bf16 %v2989_v38  ;;  %v2990_v41 = vunpack.i.l.bf16 %v2989_v38 }
 0x560   : > { %2026 = vmatprep.subr.bf16.mxu0 %v1983_v44 }
 0x561   : > { %v1917_v60 = vsel %vm648_vm15, %v2985_v55, %v2986_v7  ;;  %v1919_v25 = vsel %vm648_vm15, %v2990_v41, %v2991_v59  ;;  %2027 = vmatpush1.bf16.msra.mxu0 %v1982_v24 }
 0x562   : > { %v2349_v46 = vpack.c.bf16 %v1919_v25, %v1917_v60  ;;  %v2994_v26 = vpop.permute.xlu0 %2993 }
 0x563   : > { %v2996_v3 = vunpack.i.h.bf16 %v2994_v26  ;;  %v2995_v27 = vunpack.i.l.bf16 %v2994_v26 }
 0x564   : > { %2350 = vmatprep.subr.msk.bf16.mxu0 %vm3208_vm8, %v2349_v46 }
 0x565   : > { %v1916_v28 = vsel %vm648_vm15, %v2995_v27, %v2985_v55  ;;  %v1918_v53 = vsel %vm648_vm15, %v2996_v3, %v2990_v41 }
 0x566   : > { %v2352_v57 = vpack.c.bf16 %v1918_v53, %v1916_v28 }
 0x568   : > { %2353 = vmatpush1.bf16.msk.msra.mxu0 %vm3216_vm11, %v2352_v57 }
 0x56b   : > { %2045 = vmatmul.mubr.bf16.vlgmr.msra.gmra.mrb[12].mxu0 %v3016_v61 }
 0x56f   : > { %v1993_v30 = vpop.permute.xlu1 %1992 }
 0x573   : > { %v1998_v35 = vpop.permute.xlu0 %1997 }
 0x63e   : > { %v2046_v13 = vpop.f32.mrb[12].mxu0 }
 0x63f   : > { %v2047_v33 = vadd.f32 %v2046_v13, %v1993_v30  ;;  %v2048_v34 = vpop.f32.mrb[13].mxu0 }
 0x640   : > { %v2049_v4 = vadd.f32 %v2048_v34, %v1993_v30  ;;  %v2050_v36 = vpop.f32.mrb[14].mxu0 }
 0x641   : > { %v2055_v37 = vadd.f32 %v2047_v33, %v3560_v17  ;;  %v2051_v40 = vadd.f32 %v2050_v36, %v1998_v35  ;;  %v2052_v43 = vpop.f32.mrb[15].mxu0 }
 0x642   : > { %v2056_v20 = vadd.f32 %v2049_v4, %v3562_v29  ;;  %v2053_v21 = vadd.f32 %v2052_v43, %v1998_v35 }
 0x643   : > { %2059 = vst [vmem:[%s426_s24] sm:$0xff] %v2055_v37  ;;  %v2057_v45 = vadd.f32 %v2051_v40, %v3564_v31 }
 0x644   : > { %2060 = vst [vmem:[%s426_s24 + $0x8] sm:$0xff] %v2056_v20  ;;  %v2058_v48 = vadd.f32 %v2053_v21, %v3566_v32 }
 0x645   : > { %2061 = vst [vmem:[%s426_s24 + $0x10] sm:$0xff] %v2057_v45 }
 0x646   : > { %2062 = vst [vmem:[%s426_s24 + $0x18] sm:$0xff] %v2058_v48 }
 0x647 PF: > { %s21_s17 = sadd.s32 1, %s3023_s17  }
 0x648   : > { %p18_p4 = scmp.ge.s32.totalorder %s21_s17, 4  }
 0x64a   :  { %20 = sbr.rel (!%p18_p4) target bundleno = 1 (0x1), region = 100 }

</bundles_post_ra>
